<compile_context>
chip_gen: v7x
topology: tpu7x:2x2x1
jax: 0.10.0
libtpu: 0.0.40
codegen_flags: <defaults>
</compile_context>

<pallas_src>
import math
from functools import partial

import jax
import jax.numpy as jnp
from jax.experimental import pallas as pl
from jax.experimental.pallas import tpu as pltpu

F32 = jnp.float32
MXU_DTYPE = jnp.bfloat16          # bf16 inputs / f32 accumulate on big contractions
SSP_SHIFT = math.log(2.0)         # softplus(0), the ShiftedSoftplus shift

RAD1 = dict(max_radius=10.0, nb=20, h=12)
RAD2 = dict(max_radius=20.0, nb=40, h=12)

# conv2 path list in the reference visit order (i outer, f middle, o inner)
PATHS2 = tuple((i, f, o) for i in range(3) for f in range(3)
               for o in range(abs(f - i), min(i + f + 1, 3)))        # 15 paths


# ----------------------------------------------------------------------------
# small math helpers (usable inside kernels)
# ----------------------------------------------------------------------------
def _round_up(x, m):
    return ((x + m - 1) // m) * m


def _ssp(x):
    # shifted softplus, numerically stable
    return jnp.log(1.0 + jnp.exp(-jnp.abs(x))) + jnp.maximum(x, 0.0) - SSP_SHIFT


def _elu(x):
    return jnp.where(x > 0.0, x, jnp.exp(jnp.minimum(x, 0.0)) - 1.0)


def _rownorm(x):
    # TODO(synk): exact e3nn Norm() semantics unavailable; approximated as
    # per-node L2 normalization of the whole field (rotation invariant).
    return x * jax.lax.rsqrt(jnp.sum(x * x, axis=-1, keepdims=True) + 1e-12)


# ----------------------------------------------------------------------------
# Pallas kernels
# ----------------------------------------------------------------------------
def _path_message(xe_b, h_aug, w2x, t13, s13, erep, yexp):
    """One conv path: radial-weighted channel mixing + angular expansion.

    m[e,o]        = sum_{hh,i} h_aug[e,hh] * xe[e,i] * W2x[i, hh*40+o]   (MXU)
    msg[e,o*d+mm] = m[e,o] * y[e,mm]          (mul-major / m-minor, lane-dense)
    """
    q = jnp.dot(xe_b, w2x, preferred_element_type=F32)               # [ET, 520]
    happ = jnp.dot(h_aug, t13, preferred_element_type=F32)           # [ET, 520]
    m = jnp.dot(q * happ, s13, preferred_element_type=F32)           # [ET, 40]
    if erep is None:
        return m                                                     # l_out = 0 (Y0 == 1)
    return jnp.dot(m, erep, preferred_element_type=F32) * yexp       # [ET, 40*d]


def _scatter_accumulate(out_ref, dst_row, msg_all, step):
    """Scatter-sum messages to destination nodes (one-hot built in-kernel)."""
    n_nodes, et = out_ref.shape[0], msg_all.shape[0]
    onehot = (jax.lax.broadcasted_iota(jnp.int32, (n_nodes, et), 0)
              == dst_row).astype(F32)                                # [N, ET]
    contrib = jnp.dot(onehot, msg_all, preferred_element_type=F32)   # f32 accumulation

    @pl.when(step == 0)
    def _():
        out_ref[...] = jnp.zeros_like(out_ref)

    out_ref[...] += contrib


def _conv1_kernel(xsrc_ref, rbf_ref, yexp3_ref, yexp5_ref, dst_ref,
                  wlin1_ref, w1_ref, b1_ref, w2x_ref,
                  t13_ref, s13_ref, erep3_ref, erep5_ref, out_ref):
    # TODO(synk): exact e3nn Kernel applies Y_{l_f} + Clebsch-Gordan; here the
    # angular factor Y_{l_out} is applied directly (matches e3nn l_in=0 paths).
    step = pl.program_id(0)
    # lin1 fused on the gathered source features (its output is only ever
    # consumed through the src gather in the reference forward).
    xe = jnp.dot(xsrc_ref[...], wlin1_ref[...], preferred_element_type=F32)   # [ET, 40]
    xe_b = xe.astype(MXU_DTYPE)
    # all three radial MLPs in one matmul (13th hidden unit is relu(1)=1 and
    # carries the w2 bias path)
    hall = jnp.maximum(
        jnp.dot(rbf_ref[...], w1_ref[...], preferred_element_type=F32)
        + b1_ref[...], 0.0)                                                   # [ET, 39]
    t13, s13 = t13_ref[...], s13_ref[...]
    specs = ((1, None, None),
             (3, erep3_ref[...], yexp3_ref[...]),
             (5, erep5_ref[...], yexp5_ref[...]))
    msgs = []
    for p, (_d, erep, yexp) in enumerate(specs):
        h_aug = hall[:, p * 13:(p + 1) * 13]
        msgs.append(_path_message(xe_b, h_aug, w2x_ref[p], t13, s13, erep, yexp))
    msg_all = jnp.concatenate(msgs, axis=1)                                   # [ET, 360]
    _scatter_accumulate(out_ref, dst_ref[...], msg_all, step)


def _conv2_kernel(red_ref, rbf_ref, yexp3_ref, yexp5_ref, dst_ref,
                  w1_ref, b1_ref, w2x_ref,
                  t13_ref, s13_ref, erep3_ref, erep5_ref, out_ref, *, paths):
    # TODO(synk): the l_in > 0 conv2 paths use the m-averaged field (shape
    # correct approximation of the e3nn tensor product), as before.
    step = pl.program_id(0)
    red = red_ref[...]                                                        # [ET, 120]
    xe_b = [red[:, i * 40:(i + 1) * 40].astype(MXU_DTYPE) for i in range(3)]
    hall = jnp.maximum(
        jnp.dot(rbf_ref[...], w1_ref[...], preferred_element_type=F32)
        + b1_ref[...], 0.0)                                                   # [ET, 195]
    t13, s13 = t13_ref[...], s13_ref[...]
    erep = {0: None, 1: erep3_ref[...], 2: erep5_ref[...]}
    yexp = {0: None, 1: yexp3_ref[...], 2: yexp5_ref[...]}
    groups = {0: [], 1: [], 2: []}
    for p, (l_in, _lf, l_out) in enumerate(paths):
        h_aug = hall[:, p * 13:(p + 1) * 13]
        groups[l_out].append(
            _path_message(xe_b[l_in], h_aug, w2x_ref[p], t13, s13,
                          erep[l_out], yexp[l_out]))
    msg_all = jnp.concatenate(groups[0] + groups[1] + groups[2], axis=1)      # [ET, 2040]
    _scatter_accumulate(out_ref, dst_ref[...], msg_all, step)


def _chain_kernel(s_ref, w20_ref, w21_ref, w22_ref, w30_ref, w31_ref, w32_ref,
                  g3_ref, g3b_ref, g5_ref, g5b_ref, out_ref):
    """Norm -> lin2x -> nonlin1x -> lin3x -> mean-over-m, all degrees fused."""
    s = s_ref[...]
    g3, g3b, g5, g5b = g3_ref[...], g3b_ref[...], g5_ref[...], g5b_ref[...]

    def lin(v, w_ref):      # Kronecker-expanded irrep linear (one plain matmul)
        return jnp.dot(v.astype(MXU_DTYPE), w_ref[...], preferred_element_type=F32)

    def gate(v, g, gb):     # norm-gated ShiftedSoftplus per (node, multiplicity)
        nrm = jnp.sqrt(jnp.dot(v * v, g, preferred_element_type=F32) + 1e-12)
        return v * jnp.dot(_ssp(nrm) / nrm, gb, preferred_element_type=F32)

    z0 = _rownorm(s[:, 0:40])
    z1 = _rownorm(s[:, 40:160])
    z2 = _rownorm(s[:, 160:360])
    z0, z1, z2 = lin(z0, w20_ref), lin(z1, w21_ref), lin(z2, w22_ref)
    z0, z1, z2 = _ssp(z0), gate(z1, g3, g3b), gate(z2, g5, g5b)
    z0, z1, z2 = lin(z0, w30_ref), lin(z1, w31_ref), lin(z2, w32_ref)
    # mean over m of the l>0 fields (inputs to the l_in>0 conv2 paths)
    red1 = jnp.dot(z1, g3, preferred_element_type=F32) * (1.0 / 3.0)
    red2 = jnp.dot(z2, g5, preferred_element_type=F32) * (1.0 / 5.0)
    out_ref[...] = jnp.concatenate([z0, red1, red2], axis=1)                  # [N, 120]


def _head_kernel(c_ref, batch_ref, w40_ref, w41_ref, w42_ref,
                 g3_ref, g3b_ref, g5_ref, g5b_ref,
                 d1w_ref, d1b_ref, d2w_ref, d2b_ref, d3w_ref, d3b_ref, out_ref):
    """CA chain + scatter_mean over graphs + dense1/2/3 with fused ELU."""
    c = c_ref[...]
    g3, g3b, g5, g5b = g3_ref[...], g3b_ref[...], g5_ref[...], g5b_ref[...]

    def lin(v, w_ref):
        return jnp.dot(v.astype(MXU_DTYPE), w_ref[...], preferred_element_type=F32)

    def gate(v, g, gb):
        nrm = jnp.sqrt(jnp.dot(v * v, g, preferred_element_type=F32) + 1e-12)
        return v * jnp.dot(_ssp(nrm) / nrm, gb, preferred_element_type=F32)

    c0 = _rownorm(c[:, 0:120])
    c1 = _rownorm(c[:, 120:840])
    c2 = _rownorm(c[:, 840:2040])
    c0 = _ssp(lin(c0, w40_ref))
    # The c1/c2 branches mirror the reference forward but are dead code there
    # too (their outputs are never consumed); the compiler may eliminate them.
    c1 = gate(lin(c1, w41_ref), g3, g3b)    # noqa: F841
    c2 = gate(lin(c2, w42_ref), g5, g5b)    # noqa: F841

    # scatter_mean over the graph index as an in-kernel normalized one-hot matmul
    n_graphs, n_ca = out_ref.shape[0], c0.shape[0]
    onehot = (jax.lax.broadcasted_iota(jnp.int32, (n_graphs, n_ca), 0)
              == batch_ref[...]).astype(F32)
    counts = jnp.maximum(jnp.sum(onehot, axis=1, keepdims=True), 1.0)
    pooled = jnp.dot(onehot, c0, preferred_element_type=F32) / counts         # [B, 40]

    h = _elu(jnp.dot(pooled.astype(MXU_DTYPE), d1w_ref[...],
                     preferred_element_type=F32) + d1b_ref[...])
    h = _elu(jnp.dot(h.astype(MXU_DTYPE), d2w_ref[...],
                     preferred_element_type=F32) + d2b_ref[...])
    out_ref[...] = jnp.dot(h.astype(MXU_DTYPE), d3w_ref[...],
                           preferred_element_type=F32) + d3b_ref[...]


# ----------------------------------------------------------------------------
# glue: hoisted geometry, structure matrices, parameter packing, pallas_call wrappers
# ----------------------------------------------------------------------------
def gaussian_rbf(lengths, max_radius, nb):
    centers = jnp.linspace(0.0, max_radius, nb)
    width = max_radius / nb
    return jnp.exp(-(((lengths[:, None] - centers[None, :]) / width) ** 2))


def _sph2(unit):
    # TODO(synk): constants do not match e3nn's exact SH normalization.
    x, y, z = unit[:, 0], unit[:, 1], unit[:, 2]
    return jnp.stack([x * y, y * z, (3.0 * z * z - 1.0) / (2.0 * math.sqrt(3.0)),
                      x * z, x * x - y * y], axis=1)


def _structure_matrices():
    eye40 = jnp.eye(40, dtype=F32)
    t13 = jnp.kron(jnp.eye(13, dtype=F32), jnp.ones((1, 40), F32))    # [13, 520]
    s13 = jnp.tile(eye40, (13, 1))                                    # [520, 40]
    erep3 = jnp.kron(eye40, jnp.ones((1, 3), F32))                    # [40, 120] repeat / bcast-back
    erep5 = jnp.kron(eye40, jnp.ones((1, 5), F32))                    # [40, 200]
    g3 = jnp.kron(eye40, jnp.ones((3, 1), F32))                       # [120, 40] per-mul sum pool
    g5 = jnp.kron(eye40, jnp.ones((5, 1), F32))                       # [200, 40]
    return t13, s13, erep3, erep5, g3, g5


def _pack_radial_stage(cps):
    """Pack the per-path radial MLP weights of one conv stage."""
    w1s, b1s, w2xs = [], [], []
    for cp in cps:
        nb = cp["w1"].shape[0]
        # 13th hidden unit: relu(0*rbf + 1) == 1 -> carries the w2 bias path
        w1s.append(jnp.concatenate([cp["w1"], jnp.zeros((nb, 1), F32)], axis=1))
        b1s.append(jnp.concatenate([cp["b1"], jnp.ones((1,), F32)]))
        wfull = jnp.concatenate([cp["w2"], cp["b2"][None, :]], axis=0) / math.sqrt(40.0)
        # columns ordered hh*40 + o; rows are the input channel i
        w2xs.append(wfull.reshape(13, 40, 40).transpose(2, 0, 1).reshape(40, 13 * 40))
    return (jnp.concatenate(w1s, axis=1),                     # [nb, 13*P]
            jnp.concatenate(b1s)[None, :],                    # [1, 13*P]
            jnp.stack(w2xs, axis=0).astype(MXU_DTYPE))        # [P, 40, 520] bf16


def _edge_tiling(n_edges):
    et = _round_up(n_edges, 8) if n_edges <= 512 else 512
    return et, _round_up(n_edges, et)


def _pad_rows(a, rows, value=0.0):
    if a.shape[0] == rows:
        return a
    pad = jnp.full((rows - a.shape[0],) + a.shape[1:], value, a.dtype)
    return jnp.concatenate([a, pad], axis=0)


def _const_spec(shape):
    nd = len(shape)
    return pl.BlockSpec(shape, lambda *_: (0,) * nd)


def _run_conv_stage(kernel_fn, edge_arrays, dst_row, weights, n_nodes, out_width,
                    et, nsteps):
    in_specs = ([pl.BlockSpec((et, a.shape[1]), lambda e: (e, 0)) for a in edge_arrays]
                + [pl.BlockSpec((1, et), lambda e: (0, e))]
                + [_const_spec(w.shape) for w in weights])
    return pl.pallas_call(
        kernel_fn,
        out_shape=jax.ShapeDtypeStruct((n_nodes, out_width), F32),
        grid=(nsteps,),
        in_specs=in_specs,
        out_specs=pl.BlockSpec((n_nodes, out_width), lambda e: (0, 0)),
        compiler_params=pltpu.CompilerParams(
            dimension_semantics=("arbitrary",),      # edge axis is a reduction (scatter-sum)
            vmem_limit_bytes=48 * 1024 * 1024),
    )(*edge_arrays, dst_row, *weights)


def _run_single(kernel_fn, args, out_shape):
    return pl.pallas_call(
        kernel_fn,
        out_shape=jax.ShapeDtypeStruct(out_shape, F32),
        grid=(1,),
        in_specs=[_const_spec(a.shape) for a in args],
        out_specs=_const_spec(out_shape),
        compiler_params=pltpu.CompilerParams(dimension_semantics=("arbitrary",)),
    )(*args)


# ----------------------------------------------------------------------------
# parameters
# ----------------------------------------------------------------------------
def init_params(key):
    keys = iter(jax.random.split(key, 256))

    def nrm(shape, fan_in):
        return jax.random.normal(next(keys), shape, F32) / math.sqrt(fan_in)

    def radial(nb, h, out_dim):
        return {"w1": nrm((nb, h), nb), "b1": jnp.zeros((h,), F32),
                "w2": nrm((h, out_dim), h), "b2": jnp.zeros((out_dim,), F32)}

    p = {"lin1": nrm((4, 40), 4)}
    for lo in range(3):
        p[f"conv1{lo}"] = radial(20, 12, 40 * 40)
        p[f"lin2{lo}"] = nrm((40, 40), 40)
        p[f"lin3{lo}"] = nrm((40, 40), 40)

    p["conv2"] = {}
    for (i, f, o) in PATHS2:
        p["conv2"][(i, f, o)] = radial(40, 12, 40 * 40)

    p["lin40"] = nrm((120, 40), 120)
    p["lin41"] = nrm((240, 40), 240)
    p["lin42"] = nrm((240, 40), 240)

    p["d1_w"] = nrm((40, 250), 40)
    p["d1_b"] = jnp.zeros((250,), F32)
    p["d2_w"] = nrm((250, 150), 250)
    p["d2_b"] = jnp.zeros((150,), F32)
    p["d3_w"] = nrm((150, 1), 150)
    p["d3_b"] = jnp.zeros((1,), F32)
    return p


# ----------------------------------------------------------------------------
# forward pass (mirrors EDN_Model.forward)
# ----------------------------------------------------------------------------
def edn_forward(params, x, edge_index, edge_attr, select_ca, batch, num_graphs):
    n_nodes = x.shape[0]
    n_edges = edge_index.shape[1]
    src = edge_index[0].astype(jnp.int32)
    dst = edge_index[1].astype(jnp.int32)

    # hoisted edge geometry, shared by all 18 conv paths
    lengths = jnp.sqrt(jnp.sum(edge_attr * edge_attr, axis=1) + 1e-12)
    unit = edge_attr / lengths[:, None]
    rbf1 = gaussian_rbf(lengths, RAD1["max_radius"], RAD1["nb"])
    rbf2 = gaussian_rbf(lengths, RAD2["max_radius"], RAD2["nb"])
    yexp3 = jnp.tile(unit, (1, 40))            # l=1 angular factor, lane-dense [E, 120]
    yexp5 = jnp.tile(_sph2(unit), (1, 40))     # l=2 angular factor, [E, 200]

    et, e_pad = _edge_tiling(n_edges)
    nsteps = e_pad // et
    dst_row = _pad_rows(dst, e_pad, value=-1)[None, :]   # padded edges hit no node
    rbf1_p = _pad_rows(rbf1, e_pad)
    rbf2_p = _pad_rows(rbf2, e_pad)
    yexp3_p = _pad_rows(yexp3, e_pad)
    yexp5_p = _pad_rows(yexp5, e_pad)

    t13, s13, erep3, erep5, g3, g5 = _structure_matrices()

    # ---- conv1 stage: lin1 + radial MLPs + messages + scatter (one launch) ----
    w1c1, b1c1, w2x1 = _pack_radial_stage(
        [params["conv10"], params["conv11"], params["conv12"]])
    xsrc = _pad_rows(x[src].astype(F32), e_pad)          # zero rows -> zero messages
    s_cat = _run_conv_stage(
        _conv1_kernel, [xsrc, rbf1_p, yexp3_p, yexp5_p], dst_row,
        [params["lin1"], w1c1, b1c1, w2x1, t13, s13, erep3, erep5],
        n_nodes, 360, et, nsteps)

    # ---- fused node chain: Norm -> lin2x -> nonlin1x -> lin3x -> m-mean ----
    eye3 = jnp.eye(3, dtype=F32)
    eye5 = jnp.eye(5, dtype=F32)
    chain_w = [params["lin20"].astype(MXU_DTYPE),
               jnp.kron(params["lin21"], eye3).astype(MXU_DTYPE),
               jnp.kron(params["lin22"], eye5).astype(MXU_DTYPE),
               params["lin30"].astype(MXU_DTYPE),
               jnp.kron(params["lin31"], eye3).astype(MXU_DTYPE),
               jnp.kron(params["lin32"], eye5).astype(MXU_DTYPE),
               g3, erep3, g5, erep5]
    red_cat = _run_single(_chain_kernel, [s_cat] + chain_w, (n_nodes, 120))

    # ---- conv2 stage: 15 paths + messages + scatter (one launch) ----
    w1c2, b1c2, w2x2 = _pack_radial_stage([params["conv2"][p] for p in PATHS2])
    red_src = _pad_rows(red_cat[src], e_pad)
    cat_all = _run_conv_stage(
        partial(_conv2_kernel, paths=PATHS2),
        [red_src, rbf2_p, yexp3_p, yexp5_p], dst_row,
        [w1c2, b1c2, w2x2, t13, s13, erep3, erep5],
        n_nodes, 2040, et, nsteps)

    # ---- CA selection (eager gather; data-dependent size, so not jitted) ----
    # TODO(synk): tg.utils.subgraph is skipped - its outputs are never used
    # downstream in the reference forward.
    ca_idx = jnp.nonzero(select_ca)[0]
    c_cat = cat_all[ca_idx]
    batch_ca = batch[ca_idx].astype(jnp.int32)[None, :]

    # ---- fused CA head: Norm -> lin4x -> nonlin2x -> scatter_mean -> dense ----
    # dense1/2 padded to 256 output lanes with zeros (exact, ELU(0)=0)
    d1w = jnp.pad(params["d1_w"], ((0, 0), (0, 6))).astype(MXU_DTYPE)
    d1b = jnp.pad(params["d1_b"], (0, 6))[None, :]
    d2w = jnp.pad(params["d2_w"], ((0, 6), (0, 106))).astype(MXU_DTYPE)
    d2b = jnp.pad(params["d2_b"], (0, 106))[None, :]
    d3w = jnp.pad(params["d3_w"], ((0, 106), (0, 0))).astype(MXU_DTYPE)
    d3b = params["d3_b"][None, :]
    head_w = [params["lin40"].astype(MXU_DTYPE),
              jnp.kron(params["lin41"], eye3).astype(MXU_DTYPE),
              jnp.kron(params["lin42"], eye5).astype(MXU_DTYPE),
              g3, erep3, g5, erep5, d1w, d1b, d2w, d2b, d3w, d3b]
    out = _run_single(_head_kernel, [c_cat, batch_ca] + head_w, (num_graphs, 1))
    return out[:, 0]                                      # squeeze -> [num_graphs]


# ----------------------------------------------------------------------------
if __name__ == "__main__":
    key = jax.random.PRNGKey(0)
    kp, kx, ke, ka = jax.random.split(key, 4)

    N, E, B = 16, 48, 2
    params = init_params(kp)

    x = jax.random.normal(kx, (N, 4), F32)
    per = E // B
    src0 = jax.random.randint(ke, (per,), 0, N // B)
    dst0 = jax.random.randint(jax.random.fold_in(ke, 1), (per,), 0, N // B)
    src = jnp.concatenate([src0, src0 + N // B]).astype(jnp.int32)
    dst = jnp.concatenate([dst0, dst0 + N // B]).astype(jnp.int32)
    edge_index = jnp.stack([src, dst], axis=0)
    edge_attr = jax.random.normal(ka, (E, 3), F32) * 2.0
    select_ca = (jnp.arange(N) % 4 == 0).astype(jnp.int32)   # 2 CA atoms per graph
    batch = jnp.repeat(jnp.arange(B, dtype=jnp.int32), N // B)

    out = edn_forward(params, x, edge_index, edge_attr, select_ca, batch, B)
    out = jax.block_until_ready(out)
    assert out.shape == (B,) and bool(jnp.all(jnp.isfinite(out)))
    print("KERNEL_OK")
</pallas_src>

<mosaic_0001>
module attributes {stable_mosaic.version = 11 : i64} {
  func.func @_conv1_kernel(%arg0: i32, %arg1: memref<48x4xf32, #tpu.memory_space<vmem>>, %arg2: memref<48x20xf32, #tpu.memory_space<vmem>>, %arg3: memref<48x120xf32, #tpu.memory_space<vmem>>, %arg4: memref<48x200xf32, #tpu.memory_space<vmem>>, %arg5: memref<1x48xi32, #tpu.memory_space<vmem>>, %arg6: memref<4x40xf32, #tpu.memory_space<vmem>>, %arg7: memref<20x39xf32, #tpu.memory_space<vmem>>, %arg8: memref<1x39xf32, #tpu.memory_space<vmem>>, %arg9: memref<3x40x520xbf16, #tpu.memory_space<vmem>>, %arg10: memref<13x520xf32, #tpu.memory_space<vmem>>, %arg11: memref<520x40xf32, #tpu.memory_space<vmem>>, %arg12: memref<40x120xf32, #tpu.memory_space<vmem>>, %arg13: memref<40x200xf32, #tpu.memory_space<vmem>>, %arg14: memref<16x360xf32, #tpu.memory_space<vmem>>) attributes {dimension_semantics = [#tpu.dimension_semantics<arbitrary>], iteration_bounds = array<i64: 1>, scalar_prefetch = 0 : i64, scratch_operands = 0 : i64, tpu.core_type = #tpu.core_type<tc>, window_params = [{transform_indices = @transform_0, window_bounds = array<i64: 48, 4>}, {transform_indices = @transform_1, window_bounds = array<i64: 48, 20>}, {transform_indices = @transform_2, window_bounds = array<i64: 48, 120>}, {transform_indices = @transform_3, window_bounds = array<i64: 48, 200>}, {transform_indices = @transform_4, window_bounds = array<i64: 1, 48>}, {pipeline_mode = #tpu.pipeline_mode<synchronous>, transform_indices = @transform_5, window_bounds = array<i64: 4, 40>}, {pipeline_mode = #tpu.pipeline_mode<synchronous>, transform_indices = @transform_6, window_bounds = array<i64: 20, 39>}, {pipeline_mode = #tpu.pipeline_mode<synchronous>, transform_indices = @transform_7, window_bounds = array<i64: 1, 39>}, {pipeline_mode = #tpu.pipeline_mode<synchronous>, transform_indices = @transform_8, window_bounds = array<i64: 3, 40, 520>}, {pipeline_mode = #tpu.pipeline_mode<synchronous>, transform_indices = @transform_9, window_bounds = array<i64: 13, 520>}, {pipeline_mode = #tpu.pipeline_mode<synchronous>, transform_indices = @transform_10, window_bounds = array<i64: 520, 40>}, {pipeline_mode = #tpu.pipeline_mode<synchronous>, transform_indices = @transform_11, window_bounds = array<i64: 40, 120>}, {pipeline_mode = #tpu.pipeline_mode<synchronous>, transform_indices = @transform_12, window_bounds = array<i64: 40, 200>}, {pipeline_mode = #tpu.pipeline_mode<synchronous>, transform_indices = @transform_13, window_bounds = array<i64: 16, 360>}]} {
    %c0 = arith.constant 0 : index
    %c0_0 = arith.constant 0 : index
    %0 = vector.load %arg1[%c0, %c0_0] : memref<48x4xf32, #tpu.memory_space<vmem>>, vector<48x4xf32>
    %c0_1 = arith.constant 0 : index
    %c0_2 = arith.constant 0 : index
    %1 = vector.load %arg6[%c0_1, %c0_2] : memref<4x40xf32, #tpu.memory_space<vmem>>, vector<4x40xf32>
    %cst = arith.constant dense<0.000000e+00> : vector<48x40xf32>
    %2 = tpu.matmul %0, %1, %cst {dimension_numbers = #tpu.dot_dimension_numbers<[1], [0], [0], [1], [0, 0, 1, 1], [], []>} : vector<48x4xf32>, vector<4x40xf32>, vector<48x40xf32> -> vector<48x40xf32>
    %3 = arith.truncf %2 : vector<48x40xf32> to vector<48x40xbf16>
    %c0_3 = arith.constant 0 : index
    %c0_4 = arith.constant 0 : index
    %4 = vector.load %arg2[%c0_3, %c0_4] : memref<48x20xf32, #tpu.memory_space<vmem>>, vector<48x20xf32>
    %c0_5 = arith.constant 0 : index
    %c0_6 = arith.constant 0 : index
    %5 = vector.load %arg7[%c0_5, %c0_6] : memref<20x39xf32, #tpu.memory_space<vmem>>, vector<20x39xf32>
    %cst_7 = arith.constant dense<0.000000e+00> : vector<48x39xf32>
    %6 = tpu.matmul %4, %5, %cst_7 {dimension_numbers = #tpu.dot_dimension_numbers<[1], [0], [0], [1], [0, 0, 1, 1], [], []>} : vector<48x20xf32>, vector<20x39xf32>, vector<48x39xf32> -> vector<48x39xf32>
    %c0_8 = arith.constant 0 : index
    %c0_9 = arith.constant 0 : index
    %7 = vector.load %arg8[%c0_8, %c0_9] : memref<1x39xf32, #tpu.memory_space<vmem>>, vector<1x39xf32>
    %8 = vector.broadcast %7 : vector<1x39xf32> to vector<48x39xf32>
    %9 = arith.addf %6, %8 : vector<48x39xf32>
    %cst_10 = arith.constant 0.000000e+00 : f32
    %10 = vector.broadcast %cst_10 : f32 to vector<48x39xf32>
    %11 = arith.maximumf %9, %10 : vector<48x39xf32>
    %c0_11 = arith.constant 0 : index
    %c0_12 = arith.constant 0 : index
    %12 = vector.load %arg10[%c0_11, %c0_12] : memref<13x520xf32, #tpu.memory_space<vmem>>, vector<13x520xf32>
    %c0_13 = arith.constant 0 : index
    %c0_14 = arith.constant 0 : index
    %13 = vector.load %arg11[%c0_13, %c0_14] : memref<520x40xf32, #tpu.memory_space<vmem>>, vector<520x40xf32>
    %c0_15 = arith.constant 0 : index
    %c0_16 = arith.constant 0 : index
    %14 = vector.load %arg12[%c0_15, %c0_16] : memref<40x120xf32, #tpu.memory_space<vmem>>, vector<40x120xf32>
    %c0_17 = arith.constant 0 : index
    %c0_18 = arith.constant 0 : index
    %15 = vector.load %arg3[%c0_17, %c0_18] : memref<48x120xf32, #tpu.memory_space<vmem>>, vector<48x120xf32>
    %c0_19 = arith.constant 0 : index
    %c0_20 = arith.constant 0 : index
    %16 = vector.load %arg13[%c0_19, %c0_20] : memref<40x200xf32, #tpu.memory_space<vmem>>, vector<40x200xf32>
    %c0_21 = arith.constant 0 : index
    %c0_22 = arith.constant 0 : index
    %17 = vector.load %arg4[%c0_21, %c0_22] : memref<48x200xf32, #tpu.memory_space<vmem>>, vector<48x200xf32>
    %18 = vector.extract_strided_slice %11 {offsets = [0, 0], sizes = [48, 13], strides = [1, 1]} : vector<48x39xf32> to vector<48x13xf32>
    %c0_23 = arith.constant 0 : index
    %c0_24 = arith.constant 0 : index
    %c0_25 = arith.constant 0 : index
    %19 = vector.load %arg9[%c0_23, %c0_24, %c0_25] : memref<3x40x520xbf16, #tpu.memory_space<vmem>>, vector<1x40x520xbf16>
    %20 = vector.shape_cast %19 : vector<1x40x520xbf16> to vector<40x520xbf16>
    %cst_26 = arith.constant dense<0.000000e+00> : vector<48x520xf32>
    %21 = tpu.matmul %3, %20, %cst_26 {dimension_numbers = #tpu.dot_dimension_numbers<[1], [0], [0], [1], [0, 0, 1, 1], [], []>} : vector<48x40xbf16>, vector<40x520xbf16>, vector<48x520xf32> -> vector<48x520xf32>
    %cst_27 = arith.constant dense<0.000000e+00> : vector<48x520xf32>
    %22 = tpu.matmul %18, %12, %cst_27 {dimension_numbers = #tpu.dot_dimension_numbers<[1], [0], [0], [1], [0, 0, 1, 1], [], []>} : vector<48x13xf32>, vector<13x520xf32>, vector<48x520xf32> -> vector<48x520xf32>
    %23 = arith.mulf %21, %22 : vector<48x520xf32>
    %cst_28 = arith.constant dense<0.000000e+00> : vector<48x40xf32>
    %24 = tpu.matmul %23, %13, %cst_28 {dimension_numbers = #tpu.dot_dimension_numbers<[1], [0], [0], [1], [0, 0, 1, 1], [], []>} : vector<48x520xf32>, vector<520x40xf32>, vector<48x40xf32> -> vector<48x40xf32>
    %25 = vector.extract_strided_slice %11 {offsets = [0, 13], sizes = [48, 13], strides = [1, 1]} : vector<48x39xf32> to vector<48x13xf32>
    %c1 = arith.constant 1 : index
    %c0_29 = arith.constant 0 : index
    %c0_30 = arith.constant 0 : index
    %26 = vector.load %arg9[%c1, %c0_29, %c0_30] : memref<3x40x520xbf16, #tpu.memory_space<vmem>>, vector<1x40x520xbf16>
    %27 = vector.shape_cast %26 : vector<1x40x520xbf16> to vector<40x520xbf16>
    %cst_31 = arith.constant dense<0.000000e+00> : vector<48x520xf32>
    %28 = tpu.matmul %3, %27, %cst_31 {dimension_numbers = #tpu.dot_dimension_numbers<[1], [0], [0], [1], [0, 0, 1, 1], [], []>} : vector<48x40xbf16>, vector<40x520xbf16>, vector<48x520xf32> -> vector<48x520xf32>
    %cst_32 = arith.constant dense<0.000000e+00> : vector<48x520xf32>
    %29 = tpu.matmul %25, %12, %cst_32 {dimension_numbers = #tpu.dot_dimension_numbers<[1], [0], [0], [1], [0, 0, 1, 1], [], []>} : vector<48x13xf32>, vector<13x520xf32>, vector<48x520xf32> -> vector<48x520xf32>
    %30 = arith.mulf %28, %29 : vector<48x520xf32>
    %cst_33 = arith.constant dense<0.000000e+00> : vector<48x40xf32>
    %31 = tpu.matmul %30, %13, %cst_33 {dimension_numbers = #tpu.dot_dimension_numbers<[1], [0], [0], [1], [0, 0, 1, 1], [], []>} : vector<48x520xf32>, vector<520x40xf32>, vector<48x40xf32> -> vector<48x40xf32>
    %cst_34 = arith.constant dense<0.000000e+00> : vector<48x120xf32>
    %32 = tpu.matmul %31, %14, %cst_34 {dimension_numbers = #tpu.dot_dimension_numbers<[1], [0], [0], [1], [0, 0, 1, 1], [], []>} : vector<48x40xf32>, vector<40x120xf32>, vector<48x120xf32> -> vector<48x120xf32>
    %33 = arith.mulf %32, %15 : vector<48x120xf32>
    %34 = vector.extract_strided_slice %11 {offsets = [0, 26], sizes = [48, 13], strides = [1, 1]} : vector<48x39xf32> to vector<48x13xf32>
    %c2 = arith.constant 2 : index
    %c0_35 = arith.constant 0 : index
    %c0_36 = arith.constant 0 : index
    %35 = vector.load %arg9[%c2, %c0_35, %c0_36] : memref<3x40x520xbf16, #tpu.memory_space<vmem>>, vector<1x40x520xbf16>
    %36 = vector.shape_cast %35 : vector<1x40x520xbf16> to vector<40x520xbf16>
    %cst_37 = arith.constant dense<0.000000e+00> : vector<48x520xf32>
    %37 = tpu.matmul %3, %36, %cst_37 {dimension_numbers = #tpu.dot_dimension_numbers<[1], [0], [0], [1], [0, 0, 1, 1], [], []>} : vector<48x40xbf16>, vector<40x520xbf16>, vector<48x520xf32> -> vector<48x520xf32>
    %cst_38 = arith.constant dense<0.000000e+00> : vector<48x520xf32>
    %38 = tpu.matmul %34, %12, %cst_38 {dimension_numbers = #tpu.dot_dimension_numbers<[1], [0], [0], [1], [0, 0, 1, 1], [], []>} : vector<48x13xf32>, vector<13x520xf32>, vector<48x520xf32> -> vector<48x520xf32>
    %39 = arith.mulf %37, %38 : vector<48x520xf32>
    %cst_39 = arith.constant dense<0.000000e+00> : vector<48x40xf32>
    %40 = tpu.matmul %39, %13, %cst_39 {dimension_numbers = #tpu.dot_dimension_numbers<[1], [0], [0], [1], [0, 0, 1, 1], [], []>} : vector<48x520xf32>, vector<520x40xf32>, vector<48x40xf32> -> vector<48x40xf32>
    %cst_40 = arith.constant dense<0.000000e+00> : vector<48x200xf32>
    %41 = tpu.matmul %40, %16, %cst_40 {dimension_numbers = #tpu.dot_dimension_numbers<[1], [0], [0], [1], [0, 0, 1, 1], [], []>} : vector<48x40xf32>, vector<40x200xf32>, vector<48x200xf32> -> vector<48x200xf32>
    %42 = arith.mulf %41, %17 : vector<48x200xf32>
    %43 = tpu.concatenate %24, %33, %42 in 1 : vector<48x40xf32>, vector<48x120xf32>, vector<48x200xf32> -> vector<48x360xf32>
    %c0_41 = arith.constant 0 : index
    %c0_42 = arith.constant 0 : index
    %44 = vector.load %arg5[%c0_41, %c0_42] : memref<1x48xi32, #tpu.memory_space<vmem>>, vector<1x48xi32>
    %45 = tpu.iota {dimensions = array<i32: 0>} : vector<16x48xi32>
    %46 = vector.broadcast %44 : vector<1x48xi32> to vector<16x48xi32>
    %47 = arith.cmpi eq, %45, %46 : vector<16x48xi32>
    %48 = arith.extui %47 : vector<16x48xi1> to vector<16x48xi32>
    %49 = arith.sitofp %48 : vector<16x48xi32> to vector<16x48xf32>
    %cst_43 = arith.constant dense<0.000000e+00> : vector<16x360xf32>
    %50 = tpu.matmul %49, %43, %cst_43 {dimension_numbers = #tpu.dot_dimension_numbers<[1], [0], [0], [1], [0, 0, 1, 1], [], []>} : vector<16x48xf32>, vector<48x360xf32>, vector<16x360xf32> -> vector<16x360xf32>
    %c0_i32 = arith.constant 0 : i32
    %51 = arith.cmpi eq, %arg0, %c0_i32 : i32
    %52 = arith.extui %51 : i1 to i32
    %c0_i32_44 = arith.constant 0 : i32
    %53 = arith.cmpi ne, %52, %c0_i32_44 : i32
    scf.if %53 {
      %cst_49 = arith.constant 0.000000e+00 : f32
      %57 = vector.broadcast %cst_49 : f32 to vector<16x360xf32>
      %c0_50 = arith.constant 0 : index
      %c0_51 = arith.constant 0 : index
      %58 = vector.load %arg14[%c0_50, %c0_51] : memref<16x360xf32, #tpu.memory_space<vmem>>, vector<16x360xf32>
      tpu.vector_store %arg14[%c0_50, %c0_51], %57 {strides = array<i32>} : memref<16x360xf32, #tpu.memory_space<vmem>>, vector<16x360xf32>,
    } else {
    }
    %c0_45 = arith.constant 0 : index
    %c0_46 = arith.constant 0 : index
    %54 = vector.load %arg14[%c0_45, %c0_46] : memref<16x360xf32, #tpu.memory_space<vmem>>, vector<16x360xf32>
    %55 = arith.addf %54, %50 : vector<16x360xf32>
    %c0_47 = arith.constant 0 : index
    %c0_48 = arith.constant 0 : index
    %56 = vector.load %arg14[%c0_47, %c0_48] : memref<16x360xf32, #tpu.memory_space<vmem>>, vector<16x360xf32>
    tpu.vector_store %arg14[%c0_47, %c0_48], %55 {strides = array<i32>} : memref<16x360xf32, #tpu.memory_space<vmem>>, vector<16x360xf32>,
    return
  }
  func.func @transform_0(%arg0: i32) -> (i32, i32) {
    %c0_i32 = arith.constant 0 : i32
    %c0_i32_0 = arith.constant 0 : i32
    return %arg0, %c0_i32 : i32, i32
  }
  func.func @transform_1(%arg0: i32) -> (i32, i32) {
    %c0_i32 = arith.constant 0 : i32
    %c0_i32_0 = arith.constant 0 : i32
    return %arg0, %c0_i32 : i32, i32
  }
  func.func @transform_2(%arg0: i32) -> (i32, i32) {
    %c0_i32 = arith.constant 0 : i32
    %c0_i32_0 = arith.constant 0 : i32
    return %arg0, %c0_i32 : i32, i32
  }
  func.func @transform_3(%arg0: i32) -> (i32, i32) {
    %c0_i32 = arith.constant 0 : i32
    %c0_i32_0 = arith.constant 0 : i32
    return %arg0, %c0_i32 : i32, i32
  }
  func.func @transform_4(%arg0: i32) -> (i32, i32) {
    %c0_i32 = arith.constant 0 : i32
    %c0_i32_0 = arith.constant 0 : i32
    return %c0_i32, %arg0 : i32, i32
  }
  func.func @transform_5(%arg0: i32) -> (i32, i32) {
    %c0_i32 = arith.constant 0 : i32
    %c0_i32_0 = arith.constant 0 : i32
    %c0_i32_1 = arith.constant 0 : i32
    return %c0_i32, %c0_i32_0 : i32, i32
  }
  func.func @transform_6(%arg0: i32) -> (i32, i32) {
    %c0_i32 = arith.constant 0 : i32
    %c0_i32_0 = arith.constant 0 : i32
    %c0_i32_1 = arith.constant 0 : i32
    return %c0_i32, %c0_i32_0 : i32, i32
  }
  func.func @transform_7(%arg0: i32) -> (i32, i32) {
    %c0_i32 = arith.constant 0 : i32
    %c0_i32_0 = arith.constant 0 : i32
    %c0_i32_1 = arith.constant 0 : i32
    return %c0_i32, %c0_i32_0 : i32, i32
  }
  func.func @transform_8(%arg0: i32) -> (i32, i32, i32) {
    %c0_i32 = arith.constant 0 : i32
    %c0_i32_0 = arith.constant 0 : i32
    %c0_i32_1 = arith.constant 0 : i32
    %c0_i32_2 = arith.constant 0 : i32
    return %c0_i32, %c0_i32_0, %c0_i32_1 : i32, i32, i32
  }
  func.func @transform_9(%arg0: i32) -> (i32, i32) {
    %c0_i32 = arith.constant 0 : i32
    %c0_i32_0 = arith.constant 0 : i32
    %c0_i32_1 = arith.constant 0 : i32
    return %c0_i32, %c0_i32_0 : i32, i32
  }
  func.func @transform_10(%arg0: i32) -> (i32, i32) {
    %c0_i32 = arith.constant 0 : i32
    %c0_i32_0 = arith.constant 0 : i32
    %c0_i32_1 = arith.constant 0 : i32
    return %c0_i32, %c0_i32_0 : i32, i32
  }
  func.func @transform_11(%arg0: i32) -> (i32, i32) {
    %c0_i32 = arith.constant 0 : i32
    %c0_i32_0 = arith.constant 0 : i32
    %c0_i32_1 = arith.constant 0 : i32
    return %c0_i32, %c0_i32_0 : i32, i32
  }
  func.func @transform_12(%arg0: i32) -> (i32, i32) {
    %c0_i32 = arith.constant 0 : i32
    %c0_i32_0 = arith.constant 0 : i32
    %c0_i32_1 = arith.constant 0 : i32
    return %c0_i32, %c0_i32_0 : i32, i32
  }
  func.func @transform_13(%arg0: i32) -> (i32, i32) {
    %c0_i32 = arith.constant 0 : i32
    %c0_i32_0 = arith.constant 0 : i32
    %c0_i32_1 = arith.constant 0 : i32
    return %c0_i32, %c0_i32_0 : i32, i32
  }
}

</mosaic_0001>

<bundles_post_ra>
// kernel: tpu_custom_call.1
= control target key start
LH: loop header
LB: loop body
LE: loop exit
PB: predicated region body
PF: predicated region fallthrough
CT: control target
= control target key end

     0   :  { %vm72_vm0 = vcmask 1043456   ;;  %vm53_vm1 = vcmask 31744   ;;  %vm190_vm2 = vcmask 162816   ;;  %s6474_s0 = inlined_call_operand.vmem [shape: f32[48,4], index: 0, kind: input, shape index: {}]   ;;  %s6475_s1 = inlined_call_operand.vmem [shape: f32[48,20], index: 1, kind: input, shape index: {}]   ;;  %s6476_s2 = inlined_call_operand.vmem [shape: f32[48,120], index: 2, kind: input, shape index: {}]   ;;  %s6477_s3 = inlined_call_operand.vmem [shape: f32[48,200], index: 3, kind: input, shape index: {}]   ;;  %s6478_s4 = inlined_call_operand.vmem [shape: s32[1,48], index: 4, kind: input, shape index: {}]   ;;  %s6479_s5 = inlined_call_operand.vmem [shape: f32[4,40], index: 5, kind: input, shape index: {}]   ;;  %s6480_s6 = inlined_call_operand.vmem [shape: f32[20,39], index: 6, kind: input, shape index: {}]   ;;  %s6481_s7 = inlined_call_operand.vmem [shape: f32[1,39], index: 7, kind: input, shape index: {}]   ;;  %s6482_s8 = inlined_call_operand.vmem [shape: bf16[3,40,520], index: 8, kind: input, shape index: {}]   ;;  %s6483_s9 = inlined_call_operand.vmem [shape: f32[13,520], index: 9, kind: input, shape index: {}]   ;;  %s6484_s10 = inlined_call_operand.vmem [shape: f32[520,40], index: 10, kind: input, shape index: {}]   ;;  %s6485_s11 = inlined_call_operand.vmem [shape: f32[40,120], index: 11, kind: input, shape index: {}]   ;;  %s6486_s12 = inlined_call_operand.vmem [shape: f32[40,200], index: 12, kind: input, shape index: {}]   ;;  %s6487_s13 = inlined_call_operand.hbm [shape: f32[16,360], index: 13, kind: output, shape index: {}]  }
   0x1   :  { %v52_v0 = vld [vmem:[%s6479_s5] sm:$0xf]  ;;  %v47_v2 = vld [vmem:[%s6474_s0 + $0x8] sm:$0xff]  ;;  %v48_v3 = vld [vmem:[%s6474_s0 + $0x10] sm:$0xff] }
   0x2   :  { %v46_v1 = vld [vmem:[%s6474_s0] sm:$0xff]  ;;  %4428 = vmatprep.subr.msk.mxu0 %vm72_vm0, %v52_v0  ;;  %v181_v5 = vld [vmem:[%s6480_s6 + $0x8] sm:$0xff]  ;;  %v49_v8 = vld [vmem:[%s6474_s0 + $0x18] sm:$0xff] }
   0x3   :  { %4430 = vmatprep.mubr.msk.f32.mxu0 %vm53_vm1, %v46_v1  ;;  %4429 = vmatpush3.msk.msra.mxu0 %vm72_vm0, %v52_v0  ;;  %v180_v4 = vld [vmem:[%s6480_s6] sm:$0xff]  ;;  %v182_v9 = vld [vmem:[%s6480_s6 + $0x10] sm:$0xf]  ;;  %v51_v11 = vld [vmem:[%s6474_s0 + $0x28] sm:$0xff] }
   0x4   :  { %4431 = vmatmul.mubr.msk.f32.vlgmr.msra.gmra.mrb[0].mxu0 %vm53_vm1, %v47_v2  ;;  %v4614_v6 = vpack.c.bf16 %v181_v5, %v180_v4  ;;  %v174_v7 = vld [vmem:[%s6475_s1] sm:$0xff]  ;;  %v175_v12 = vld [vmem:[%s6475_s1 + $0x8] sm:$0xff]  ;;  %v176_v15 = vld [vmem:[%s6475_s1 + $0x10] sm:$0xff] }
   0x5   :  { %4433 = vmatprep.mubr.msk.f32.mxu0 %vm53_vm1, %v48_v3  ;;  %4445 = vmatprep.mubr.msk.f32.mxu1 %vm190_vm2, %v174_v7  ;;  %v50_v10 = vld [vmem:[%s6474_s0 + $0x20] sm:$0xff]  ;;  %v4963_v16 = vld [vmem:[%s6482_s8 + $0x8] ss:$20 sps:$4 sm:$0xff]   ;;  %v433_v22 = vld [vmem:[%s6482_s8 + $0x50] sm:$0xff] }
   0x6   :  { %4615 = vmatprep.subr.bf16.mxu1 %v4614_v6  ;;  %v4960_v13 = vld [vmem:[%s6482_s8] ss:$20 sps:$4 sm:$0xff]   ;;  %v4962_v14 = vld [vmem:[%s6482_s8 + $0x4] ss:$20 sps:$4 sm:$0xff]   ;;  %v4966_v20 = vld [vmem:[%s6482_s8 + $0x28] ss:$20 sps:$4 sm:$0xff]   ;;  %v3827_v25 = vcombine.high %v433_v22, %v433_v22 }
   0x7   :  { %4617 = vmatpush3.bf16.msra.mxu1 %v4614_v6  ;;  %526 = vmatprep.subr.bf16.mxu0 %v4962_v14  ;;  %v4965_v17 = vld [vmem:[%s6482_s8 + $0xc] ss:$20 sps:$4 sm:$0xff]   ;;  %v177_v19 = vld [vmem:[%s6475_s1 + $0x18] sm:$0xff]  ;;  %v4971_v21 = vld [vmem:[%s6482_s8 + $0x34] ss:$20 sps:$4 sm:$0xff]  }
   0x8   :  { %4434 = vmatmul.mubr.msk.f32.gmra.mrb[2].mxu0 %vm53_vm1, %v49_v8  ;;  %4443 = vmatprep.subr.msk.mxu1 %vm72_vm0, %v182_v9  ;;  %v4968_v18 = vld [vmem:[%s6482_s8 + $0x2c] ss:$20 sps:$4 sm:$0xff]   ;;  %v4969_v24 = vld [vmem:[%s6482_s8 + $0x30] ss:$20 sps:$4 sm:$0xff]  }
   0x9   :  { %4436 = vmatprep.mubr.msk.f32.mxu0 %vm53_vm1, %v50_v10  ;;  %527 = vmatpush1.bf16.msra.mxu0 %v4960_v13  ;;  %v178_v23 = vld [vmem:[%s6475_s1 + $0x20] sm:$0xff]  ;;  %v179_v26 = vld [vmem:[%s6475_s1 + $0x28] sm:$0xff] }
   0xa   :  { %528 = vmatprep.subr.bf16.mxu0 %v4968_v18 }
   0xb   :  { %4444 = vmatpush3.msk.msra.mxu1 %vm72_vm0, %v182_v9 }
   0xc   :  { %4437 = vmatmul.mubr.msk.f32.gmra.mrb[4].mxu0 %vm53_vm1, %v51_v11  ;;  %4446 = vmatmul.mubr.msk.f32.vlgmr.msra.gmra.mrb[0].mxu1 %vm190_vm2, %v175_v12 }
   0xd   :  { %4448 = vmatprep.mubr.msk.f32.mxu1 %vm190_vm2, %v176_v15  ;;  %589 = vmatprep.subr.bf16.mxu1 %v4965_v17 }
   0xe   :  { %590 = vmatpush1.bf16.msra.mxu1 %v4963_v16  ;;  %529 = vmatpush1.bf16.msra.mxu0 %v4966_v20 }
   0xf   :  { %591 = vmatprep.subr.bf16.mxu1 %v4971_v21  ;;  %3831 = vmatprep.subr.msk.bf16.mxu0 %vm72_vm0, %v3827_v25 }
  0x10   :  { %4449 = vmatmul.mubr.msk.f32.gmra.mrb[2].mxu1 %vm190_vm2, %v177_v19 }
  0x11   :  { %4451 = vmatprep.mubr.msk.f32.mxu1 %vm190_vm2, %v178_v23 }
  0x12   :  { %592 = vmatpush1.bf16.msra.mxu1 %v4969_v24 }
  0x14   :  { %4452 = vmatmul.mubr.msk.f32.gmra.mrb[4].mxu1 %vm190_vm2, %v179_v26 }
  0x15   :  { %18 = vsyncpa [#allocation3], 0  ;;  %v434_v27 = vld [vmem:[%s6482_s8 + $0x58] sm:$0xff]  ;;  %v3826_v28 = vcombine.low %v433_v22, %v433_v22  ;;  %v6490_v33 = vmov 0   ;;  %v6488_v34 = vmov 0.0   ;;  %v314_v35 = vld [vmem:[%s6483_s9 + $0x8] sm:$0xff] }
  0x16   :  { %v3829_v29 = vcombine.high %v434_v27, %v434_v27  ;;  %v3828_v30 = vcombine.low %v434_v27, %v434_v27  ;;  %558 = vmatprep.mubr.bf16.mxu0 %v6490_v33  ;;  %621 = vmatprep.mubr.bf16.mxu1 %v6490_v33  ;;  %vm728_vm3 = vcmask 1044480   ;;  %v319_v36 = vld [vmem:[%s6483_s9 + $0x30] sm:$0x1f]  ;;  %vm5044_vm4 = vmmov 1   ;;  %v313_v40 = vld [vmem:[%s6483_s9] sm:$0xff]  ;;  %v316_v57 = vld [vmem:[%s6483_s9 + $0x18] sm:$0xff] }
  0x17   :  { %v512_v31 = vsel %vm72_vm0, %v3826_v28, 0  ;;  %v5230_v37 = vpack.c.bf16 %v319_v36, %v314_v35  ;;  %vm5232_vm5 = vmpackc.low %vm728_vm3, %vm5044_vm4  ;;  %vm501_vm6 = vcmask 326656   ;;  %v318_v41 = vld [vmem:[%s6483_s9 + $0x28] sm:$0x1f]  ;;  %v4976_v43 = vld [vmem:[%s6482_s8 + $0x10] ss:$20 sps:$4 sm:$0xff]  }
  0x18   :  { %3835 = vmatprep.subr.msk.bf16.mxu1 %vm72_vm0, %v3829_v29  ;;  %v518_v32 = vsel %vm72_vm0, %v3828_v30, 0  ;;  %531 = vmatpush1.bf16.msra.mxu0 %v512_v31  ;;  %v317_v44 = vld [vmem:[%s6483_s9 + $0x20] sm:$0xff]  ;;  %v322_v45 = vld [vmem:[%s6483_s9 + $0x48] sm:$0x1f]  ;;  %v5256_v47 = vpack.c.bf16 %v318_v41, %v313_v40  ;;  %vm5046_vm7 = vmmov 0   ;;  %v315_v15 = vld [vmem:[%s6483_s9 + $0x10] sm:$0xff] }
  0x19   :  { %594 = vmatpush1.bf16.msra.mxu1 %v518_v32  ;;  %4454 = vmatprep.subr.bf16.mxu0 %v6488_v34  ;;  %v5262_v49 = vpack.c.bf16 %v322_v45, %v317_v44  ;;  %v4977_v51 = vld [vmem:[%s6482_s8 + $0x38] ss:$20 sps:$4 sm:$0xff]   ;;  %v4978_v53 = vld [vmem:[%s6482_s8 + $0x60] ss:$0 sps:$4 sm:$0xff]   ;;  %vm709_vm8 = vcmask 105472   ;;  %s5047_s29 = smov 102  }
  0x1a   :  { %4620 = vmatprep.subr.msk.bf16.mxu1 %vm5232_vm5, %v5230_v37  ;;  %v3808_v54 = vld [vmem:[%s6481_s7] ss:$0 sm:$0xff]  ;;  %v524_v63 = vsel %vm72_vm0, %v4978_v53, 0  ;;  %s5045_s7 = smov 115   ;;  %v320_v16 = vld [vmem:[%s6483_s9 + $0x38] sm:$0x1f] }
  0x1b   :  { %v321_v58 = vld [vmem:[%s6483_s9 + $0x40] sm:$0x1f]  ;;  %v5327_v18 = vpack.c.bf16 %v320_v16, %v315_v15  ;;  %v340_v20 = vld [vmem:[%s6484_s10 + $0x88] sm:$0xff]  ;;  %v341_v25 = vld [vmem:[%s6484_s10 + $0x90] sm:$0xff]  ;;  %vm1071_vm9 = vcmask 64512   ;;  %s5048_s17 = smov 40  }
  0x1c   :  { %v5294_v0 = vpack.c.bf16 %v321_v58, %v316_v57  ;;  %v339_v19 = vld [vmem:[%s6484_s10 + $0x80] sm:$0xff]  ;;  %v324_v23 = vld [vmem:[%s6484_s10 + $0x8] sm:$0xff]  ;;  %v342_v26 = vld [vmem:[%s6484_s10 + $0x98] sm:$0xff]  ;;  %vm3551_vm10 = vcmask 261120   ;;  %vm3596_vm12 = vcmask 392192   ;;  %vm3761_vm14 = vcmask 850944  }
  0x1d   :  { %v5340_v21 = vpack.c.bf16 %v340_v20, %v339_v19  ;;  %v323_v22 = vld [vmem:[%s6484_s10] sm:$0xff]  ;;  %v5410_v27 = vpack.c.bf16 %v342_v26, %v341_v25  ;;  %v325_v28 = vld [vmem:[%s6484_s10 + $0x10] sm:$0xff]  ;;  %v326_v29 = vld [vmem:[%s6484_s10 + $0x18] sm:$0xff] }
  0x1e   :  { %v5380_v24 = vpack.c.bf16 %v324_v23, %v323_v22  ;;  %v5418_v30 = vpack.c.bf16 %v326_v29, %v325_v28  ;;  %v343_v31 = vld [vmem:[%s6484_s10 + $0xa0] sm:$0xff]  ;;  %v344_v32 = vld [vmem:[%s6484_s10 + $0xa8] sm:$0xff]  ;;  %v345_v41 = vld [vmem:[%s6484_s10 + $0xb0] sm:$0xff] }
  0x1f   :  { %v5428_v35 = vpack.c.bf16 %v344_v32, %v343_v31  ;;  %v327_v36 = vld [vmem:[%s6484_s10 + $0x20] sm:$0xff]  ;;  %v329_v44 = vld [vmem:[%s6484_s10 + $0x30] sm:$0xff]  ;;  %v330_v45 = vld [vmem:[%s6484_s10 + $0x38] sm:$0xff] }
  0x20   :  { %v349_v57 = vld [vmem:[%s6484_s10 + $0xd0] sm:$0xff]  ;;  %v350_v58 = vld [vmem:[%s6484_s10 + $0xd8] sm:$0xff]  ;;  %v375_v29 = vld [vmem:[%s6484_s10 + $0x1a0] sm:$0xff] }
  0x21   :  { %v353_v15 = vld [vmem:[%s6484_s10 + $0xf0] sm:$0xff]  ;;  %v358_v20 = vld [vmem:[%s6484_s10 + $0x118] sm:$0xff]  ;;  %v376_v31 = vld [vmem:[%s6484_s10 + $0x1a8] sm:$0xff] }
  0x22   :  { %v357_v19 = vld [vmem:[%s6484_s10 + $0x110] sm:$0xff]  ;;  %v338_v26 = vld [vmem:[%s6484_s10 + $0x78] sm:$0xff]  ;;  %v5572_v32 = vpack.c.bf16 %v376_v31, %v375_v29 }
  0x23   :  { %v5552_v23 = vpack.c.bf16 %v358_v20, %v357_v19  ;;  %v337_v25 = vld [vmem:[%s6484_s10 + $0x70] sm:$0xff]  ;;  %v370_v31 = vld [vmem:[%s6484_s10 + $0x178] sm:$0xff] }
  0x24   :  { %v5561_v28 = vpack.c.bf16 %v338_v26, %v337_v25  ;;  %6554 = vst [vmem:[#allocation20_spill] sm:$0xff] %v5572_v32  ;;  %v385_v20 = vld [vmem:[%s6484_s10 + $0x1f0] sm:$0xff]  ;;  %v386_v25 = vld [vmem:[%s6484_s10 + $0x1f8] sm:$0xff] }
  0x25   :  { %6552 = vst [vmem:[#allocation18_spill] sm:$0xff] %v5552_v23  ;;  %v5662_v26 = vpack.c.bf16 %v386_v25, %v385_v20  ;;  %v369_v29 = vld [vmem:[%s6484_s10 + $0x170] sm:$0xff] }
  0x26   :  { %6553 = vst [vmem:[#allocation19_spill] sm:$0xff] %v5561_v28 }
  0x27   :  { %6564 = vst [vmem:[#allocation30_spill] sm:$0xff] %v5662_v26 }
  0xd7   :  { %v4432_v39 = vpop.f32.mrb[0].mxu0 }
  0xd8   :  { %v142_v42 = vpop.f32.mrb[1].mxu0 }
  0xd9   :  { %v5254_v46 = vpack.c.bf16 %v4432_v39, %v142_v42  ;;  %v328_v39 = vld [vmem:[%s6484_s10 + $0x28] sm:$0xff]  ;;  %v346_v42 = vld [vmem:[%s6484_s10 + $0xb8] sm:$0xff] }
  0xda   :  { %v5436_v40 = vpack.c.bf16 %v328_v39, %v327_v36  ;;  %v359_v36 = vld [vmem:[%s6484_s10 + $0x120] sm:$0xff]  ;;  %v360_v39 = vld [vmem:[%s6484_s10 + $0x128] sm:$0xff] }
  0xdb   :  { %3832 = vmatmul.mubr.msk.bf16.vlgmr.msra.gmra.mrb[8].mxu0 %vm501_vm6, %v5254_v46  ;;  %3836 = vmatmul.mubr.msk.bf16.vlgmr.msra.gmra.mrb[8].mxu1 %vm501_vm6, %v5254_v46  ;;  %v4435_v48 = vpop.f32.mrb[2].mxu0 }
  0xdc   :  { %4455 = vmatpush3.bf16.msra.mxu0 %v4976_v43  ;;  %v152_v50 = vpop.f32.mrb[3].mxu0  ;;  %568 = vmatprep.mubr.bf16.mxu0 %v6490_v33  ;;  %6539 = vst [vmem:[#allocation5_spill] sm:$0xff] %v5436_v40  ;;  %v5446_v43 = vpack.c.bf16 %v346_v42, %v345_v41  ;;  %v5580_v41 = vpack.c.bf16 %v360_v39, %v359_v36  ;;  %v377_v42 = vld [vmem:[%s6484_s10 + $0x1b0] sm:$0xff]  ;;  %v5677_v39 = vld [vmem:[%s6484_s10 + $0x200] sm:$0xff] }
  0xdd   :  { %v5268_v52 = vpack.c.bf16 %v4435_v48, %v152_v50  ;;  %631 = vmatprep.mubr.bf16.mxu1 %v6490_v33  ;;  %4456 = vmatprep.subr.bf16.mxu0 %v6488_v34  ;;  %v5454_v48 = vpack.c.bf16 %v330_v45, %v329_v44  ;;  %v347_v50 = vld [vmem:[%s6484_s10 + $0xc0] sm:$0xff]  ;;  %v378_v44 = vld [vmem:[%s6484_s10 + $0x1b8] sm:$0xff]  ;;  %v5670_v36 = vpack.c.bf16 %v370_v31, %v369_v29 }
  0xde   :  { %4623 = vmatpush1.bf16.msk.msra.mxu1 %vm5232_vm5, %v5256_v47  ;;  %6540 = vst [vmem:[#allocation6_spill] sm:$0xff] %v5446_v43  ;;  %6555 = vst [vmem:[#allocation21_spill] sm:$0xff] %v5580_v41  ;;  %v5590_v45 = vpack.c.bf16 %v378_v44, %v377_v42  ;;  %v4981_v42 = vld [vmem:[%s6482_s8 + $0x68] ss:$20 sps:$4 sm:$0xff]  }
  0xdf   :  { %v4438_v55 = vpop.f32.mrb[4].mxu0  ;;  %v4447_v56 = vpop.f32.mrb[0].mxu1  ;;  %4632 = vmatprep.subr.msk.bf16.mxu1 %vm5232_vm5, %v5262_v49  ;;  %6541 = vst [vmem:[#allocation7_spill] sm:$0xff] %v5454_v48  ;;  %6565 = vst [vmem:[#allocation31_spill] sm:$0xff] %v5670_v36 }
  0xe0   :  { %4457 = vmatpush3.bf16.msra.mxu0 %v4977_v51  ;;  %v162_v59 = vpop.f32.mrb[5].mxu0  ;;  %v278_v60 = vpop.f32.mrb[1].mxu1  ;;  %v284_v1 = vadd.f32 %v4447_v56, %v3808_v54  ;;  %v348_v51 = vld [vmem:[%s6484_s10 + $0xc8] sm:$0xff]  ;;  %6556 = vst [vmem:[#allocation22_spill] sm:$0xff] %v5590_v45 }
  0xe1   :  { %v5290_v61 = vpack.c.bf16 %v4438_v55, %v162_v59  ;;  %4458 = vmatprep.subr.bf16.mxu0 %v6488_v34  ;;  %v279_v62 = vadd.f32 %v3808_v54, %v278_v60  ;;  %v5464_v53 = vpack.c.bf16 %v348_v51, %v347_v50  ;;  %v332_v55 = vld [vmem:[%s6484_s10 + $0x48] sm:$0xff]  ;;  %v5482_v59 = vpack.c.bf16 %v350_v58, %v349_v57  ;;  %v333_v60 = vld [vmem:[%s6484_s10 + $0x50] sm:$0xff]  ;;  %v362_v51 = vld [vmem:[%s6484_s10 + $0x138] sm:$0xff] }
  0xe2   :  { %v5308_v6 = vmax.f32 %v284_v1, 0.0  ;;  %v371_v1 = vld [vmem:[%s6484_s10 + $0x180] sm:$0xff]  ;;  %v361_v50 = vld [vmem:[%s6484_s10 + $0x130] sm:$0xff]  ;;  %v380_v57 = vld [vmem:[%s6484_s10 + $0x1c8] sm:$0xff] }
  0xe3   :  { %3833 = vmatmul.mubr.msk.bf16.gmra.mrb[12].mxu0 %vm501_vm6, %v5268_v52  ;;  %3837 = vmatmul.mubr.msk.bf16.gmra.mrb[12].mxu1 %vm501_vm6, %v5268_v52  ;;  %v5300_v2 = vmax.f32 %v279_v62, 0.0  ;;  %v4450_v3 = vpop.f32.mrb[2].mxu1  ;;  %6542 = vst [vmem:[#allocation8_spill] sm:$0xff] %v5464_v53  ;;  %6544 = vst [vmem:[#allocation10_spill] sm:$0xff] %v5482_v59  ;;  %v334_v62 = vld [vmem:[%s6484_s10 + $0x58] sm:$0xff] }
  0xe4   :  { %578 = vmatprep.mubr.bf16.mxu0 %v6490_v33  ;;  %641 = vmatprep.mubr.bf16.mxu1 %v6490_v33  ;;  %v288_v4 = vpop.f32.mrb[3].mxu1  ;;  %v294_v7 = vadd.f32 %v4450_v3, %v3808_v54  ;;  %v351_v3 = vld [vmem:[%s6484_s10 + $0xe0] sm:$0xff] }
  0xe5   :  { %4459 = vmatpush3.bf16.msra.mxu0 %v524_v63  ;;  %v289_v5 = vadd.f32 %v3808_v54, %v288_v4  ;;  %1654 = vrot.lane.b32.xlu0 %v5300_v2, %s5045_s7  ;;  %v5490_v63 = vpack.c.bf16 %v334_v62, %v333_v60  ;;  %v363_v60 = vld [vmem:[%s6484_s10 + $0x140] sm:$0xff]  ;;  %v364_v62 = vld [vmem:[%s6484_s10 + $0x148] sm:$0xff] }
  0xe6   :  { %4626 = vmatprep.subr.msk.bf16.mxu0 %vm5232_vm5, %v5294_v0  ;;  %v310_v13 = vmax.f32 %v294_v7, 0.0  ;;  %v356_v7 = vld [vmem:[%s6484_s10 + $0x108] sm:$0xff] }
  0xe7   :  { %v5310_v8 = vmax.f32 %v289_v5, 0.0  ;;  %v4453_v9 = vpop.f32.mrb[4].mxu1  ;;  %6545 = vst [vmem:[#allocation11_spill] sm:$0xff] %v5490_v63  ;;  %v352_v5 = vld [vmem:[%s6484_s10 + $0xe8] sm:$0xff] }
  0xe8   :  { %v298_v10 = vpop.f32.mrb[5].mxu1  ;;  %v304_v11 = vadd.f32 %v4453_v9, %v3808_v54 }
  0xe9   :  { %v299_v12 = vadd.f32 %v3808_v54, %v298_v10  ;;  %1658 = vrot.lane.b32.xlu1 %v5310_v8, %s5045_s7  ;;  %1656 = vrot.lane.b32.xlu0 %v5308_v6, %s5045_s7  ;;  %v331_v54 = vld [vmem:[%s6484_s10 + $0x40] sm:$0xff] }
  0xea   :  { %v312_v17 = vmax.f32 %v304_v11, 0.0  ;;  %v5472_v56 = vpack.c.bf16 %v332_v55, %v331_v54  ;;  %v335_v10 = vld [vmem:[%s6484_s10 + $0x60] sm:$0xff]  ;;  %v336_v11 = vld [vmem:[%s6484_s10 + $0x68] sm:$0xff]  ;;  %v5598_v54 = vpack.c.bf16 %v362_v51, %v361_v50 }
  0xeb   :  { %3834 = vmatmul.mubr.msk.bf16.gmra.mrb[16].mxu0 %vm501_vm6, %v5290_v61  ;;  %3838 = vmatmul.mubr.msk.bf16.gmra.mrb[16].mxu1 %vm501_vm6, %v5290_v61  ;;  %v311_v14 = vmax.f32 %v299_v12, 0.0  ;;  %v5525_v12 = vpack.c.bf16 %v336_v11, %v335_v10  ;;  %v379_v55 = vld [vmem:[%s6484_s10 + $0x1c0] sm:$0xff] }
  0xec   :  { %4460 = vmatprep.mubr.msk.bf16.mxu0 %vm5046_vm7, %v6488_v34  ;;  %808 = vmatprep.mubr.f32.mxu1 %v6488_v34  ;;  %6543 = vst [vmem:[#allocation9_spill] sm:$0xff] %v5472_v56  ;;  %6557 = vst [vmem:[#allocation23_spill] sm:$0xff] %v5598_v54  ;;  %v5608_v58 = vpack.c.bf16 %v380_v57, %v379_v55  ;;  %v383_v11 = vld [vmem:[%s6484_s10 + $0x1e0] sm:$0xff] }
  0xed   :  { %1660 = vrot.lane.b32.xlu1 %v310_v13, %s5045_s7  ;;  %1662 = vrot.lane.b32.xlu0 %v311_v14, %s5045_s7  ;;  %6549 = vst [vmem:[#allocation15_spill] sm:$0xff] %v5525_v12 }
  0xee   :  { %6558 = vst [vmem:[#allocation24_spill] sm:$0xff] %v5608_v58 }
  0xf1   :  { %1664 = vrot.lane.b32.xlu1 %v312_v17, %s5045_s7  ;;  %2706 = vrot.lane.b32.xlu0 %v5300_v2, %s5047_s29 }
  0xf3   :  { %4461 = vmatmul.mubr.msk.bf16.vlgmr.msra.gmra.mrb[20].mxu0 %vm501_vm6, %v5254_v46  ;;  %3844 = vmatmul.mubr.msk.f32.vlgmr.msra.gmra.mrb[6].mxu1 %vm709_vm8, %v5300_v2 }
  0xf4   :  { %4629 = vmatpush1.bf16.msk.msra.mxu0 %vm5232_vm5, %v5327_v18  ;;  %814 = vmatprep.mubr.f32.mxu1 %v6488_v34 }
  0xf5   :  { %4464 = vmatprep.mubr.msk.bf16.mxu0 %vm5046_vm7, %v6488_v34  ;;  %4635 = vmatpush3.bf16.msk.msra.mxu1 %vm5232_vm5, %v5262_v49 }
  0xf6   :  { %2708 = vrot.lane.b32.xlu1 %v5308_v6, %s5047_s29  ;;  %2710 = vrot.lane.b32.xlu0 %v5310_v8, %s5047_s29 }
  0xf7   :  { %3845 = vmatmul.mubr.msk.f32.gmra.mrb[20].mxu1 %vm709_vm8, %v5308_v6  ;;  %4637 = vmatprep.subr.bf16.mxu0 %v5340_v21 }
  0xf8   :  { %820 = vmatprep.mubr.f32.mxu1 %v6488_v34 }
  0xfa   :  { %2712 = vrot.lane.b32.xlu1 %v310_v13, %s5047_s29  ;;  %2714 = vrot.lane.b32.xlu0 %v311_v14, %s5047_s29 }
  0xfb   :  { %4465 = vmatmul.mubr.msk.bf16.gmra.mrb[24].mxu0 %vm501_vm6, %v5268_v52  ;;  %3846 = vmatmul.mubr.msk.f32.gmra.mrb[22].mxu1 %vm709_vm8, %v5310_v8 }
  0xfc   :  { %826 = vmatprep.mubr.f32.mxu1 %v6488_v34  ;;  %4468 = vmatprep.mubr.msk.bf16.mxu0 %vm5046_vm7, %v6488_v34 }
  0xfe   :  { %2716 = vrot.lane.b32.xlu1 %v312_v17, %s5047_s29 }
  0xff   :  { %3847 = vmatmul.mubr.msk.f32.gmra.mrb[24].mxu1 %vm709_vm8, %v310_v13 }
 0x100   :  { %832 = vmatprep.mubr.f32.mxu1 %v6488_v34 }
 0x103   :  { %4469 = vmatmul.mubr.msk.bf16.gmra.mrb[28].mxu0 %vm501_vm6, %v5290_v61  ;;  %3848 = vmatmul.mubr.msk.f32.gmra.mrb[26].mxu1 %vm709_vm8, %v311_v14 }
 0x104   :  { %838 = vmatprep.mubr.f32.mxu1 %v6488_v34  ;;  %909 = vmatprep.mubr.f32.mxu0 %v6488_v34 }
 0x107   :  { %3849 = vmatmul.mubr.msk.f32.gmra.mrb[28].mxu1 %vm709_vm8, %v312_v17 }
 0x108   :  { %4476 = vmatprep.mubr.msk.f32.mxu1 %vm709_vm8, %v5300_v2 }
 0x10b   :  { %3852 = vmatmul.mubr.msk.f32.vlgmr.msra.gmra.mrb[6].mxu0 %vm709_vm8, %v5300_v2  ;;  %4477 = vmatmul.mubr.msk.f32.vlgmr.msra.gmra.mrb[30].mxu1 %vm709_vm8, %v5308_v6  ;;  %v372_v2 = vld [vmem:[%s6484_s10 + $0x188] sm:$0xff] }
 0x10c   :  { %915 = vmatprep.mubr.f32.mxu0 %v6488_v34  ;;  %4479 = vmatprep.mubr.msk.f32.mxu1 %vm709_vm8, %v5310_v8  ;;  %v5503_v4 = vpack.c.bf16 %v372_v2, %v371_v1  ;;  %v5616_v1 = vpack.c.bf16 %v364_v62, %v363_v60  ;;  %v381_v2 = vld [vmem:[%s6484_s10 + $0x1d0] sm:$0xff] }
 0x10d   :  { %4639 = vmatpush3.bf16.msra.mxu0 %v5380_v24 }
 0x10e   :  { %4641 = vmatprep.subr.bf16.mxu0 %v5410_v27  ;;  %6546 = vst [vmem:[#allocation12_spill] sm:$0xff] %v5503_v4  ;;  %4669 = vmatprep.subr.bf16.mxu1 %v5503_v4  ;;  %6559 = vst [vmem:[#allocation25_spill] sm:$0xff] %v5616_v1 }
 0x10f   :  { %3853 = vmatmul.mubr.msk.f32.gmra.mrb[32].mxu0 %vm709_vm8, %v5308_v6  ;;  %4480 = vmatmul.mubr.msk.f32.gmra.mrb[32].mxu1 %vm709_vm8, %v310_v13  ;;  %v355_v6 = vld [vmem:[%s6484_s10 + $0x100] sm:$0xff] }
 0x110   :  { %921 = vmatprep.mubr.f32.mxu0 %v6488_v34  ;;  %4482 = vmatprep.mubr.msk.f32.mxu1 %vm709_vm8, %v311_v14  ;;  %v5516_v9 = vpack.c.bf16 %v356_v7, %v355_v6  ;;  %v365_v6 = vld [vmem:[%s6484_s10 + $0x150] sm:$0xff]  ;;  %v366_v7 = vld [vmem:[%s6484_s10 + $0x158] sm:$0xff] }
 0x111   :  { %4643 = vmatpush3.bf16.msra.mxu0 %v5418_v30  ;;  %v5634_v10 = vpack.c.bf16 %v366_v7, %v365_v6 }
 0x112   :  { %4645 = vmatprep.subr.bf16.mxu0 %v5428_v35  ;;  %6548 = vst [vmem:[#allocation14_spill] sm:$0xff] %v5516_v9  ;;  %4671 = vmatpush3.bf16.msra.mxu1 %v5516_v9 }
 0x113   :  { %3854 = vmatmul.mubr.msk.f32.gmra.mrb[34].mxu0 %vm709_vm8, %v5310_v8  ;;  %4483 = vmatmul.mubr.msk.f32.gmra.mrb[34].mxu1 %vm709_vm8, %v312_v17  ;;  %v5514_v8 = vpack.c.bf16 %v352_v5, %v351_v3  ;;  %v382_v3 = vld [vmem:[%s6484_s10 + $0x1d8] sm:$0xff]  ;;  %6561 = vst [vmem:[#allocation27_spill] sm:$0xff] %v5634_v10 }
 0x114   :  { %927 = vmatprep.mubr.f32.mxu0 %v6488_v34  ;;  %v5626_v5 = vpack.c.bf16 %v382_v3, %v381_v2 }
 0x115   :  { %4647 = vmatpush3.bf16.msra.mxu0 %v5436_v40  ;;  %6547 = vst [vmem:[#allocation13_spill] sm:$0xff] %v5514_v8 }
 0x116   :  { %4649 = vmatprep.subr.bf16.mxu0 %v5446_v43  ;;  %6560 = vst [vmem:[#allocation26_spill] sm:$0xff] %v5626_v5 }
 0x117   :  { %3855 = vmatmul.mubr.msk.f32.gmra.mrb[36].mxu0 %vm709_vm8, %v310_v13  ;;  %v373_v13 = vld [vmem:[%s6484_s10 + $0x190] sm:$0xff] }
 0x118   :  { %933 = vmatprep.mubr.f32.mxu0 %v6488_v34 }
 0x119   :  { %4651 = vmatpush3.bf16.msra.mxu0 %v5454_v48 }
 0x11a   :  { %4653 = vmatprep.subr.bf16.mxu0 %v5464_v53  ;;  %v4984_v53 = vld [vmem:[%s6482_s8 + $0x70] ss:$20 sps:$4 sm:$0xff]  }
 0x11b   :  { %3856 = vmatmul.mubr.msk.f32.gmra.mrb[38].mxu0 %vm709_vm8, %v311_v14  ;;  %v374_v14 = vld [vmem:[%s6484_s10 + $0x198] sm:$0xff] }
 0x11c   :  { %939 = vmatprep.mubr.f32.mxu0 %v6488_v34  ;;  %v5539_v16 = vpack.c.bf16 %v374_v14, %v373_v13  ;;  %v384_v13 = vld [vmem:[%s6484_s10 + $0x1e8] sm:$0xff] }
 0x11d   :  { %4655 = vmatpush3.bf16.msra.mxu0 %v5472_v56  ;;  %v5644_v14 = vpack.c.bf16 %v384_v13, %v383_v11 }
 0x11e   :  { %4657 = vmatprep.subr.bf16.mxu0 %v5482_v59  ;;  %6550 = vst [vmem:[#allocation16_spill] sm:$0xff] %v5539_v16  ;;  %4673 = vmatprep.subr.bf16.mxu1 %v5539_v16 }
 0x11f   :  { %3857 = vmatmul.mubr.msk.f32.gmra.mrb[40].mxu0 %vm709_vm8, %v312_v17  ;;  %v354_v17 = vld [vmem:[%s6484_s10 + $0xf8] sm:$0xff]  ;;  %4675 = vmatpush3.bf16.msra.mxu1 %v5552_v23  ;;  %6562 = vst [vmem:[#allocation28_spill] sm:$0xff] %v5644_v14 }
 0x120   :  { %v5550_v22 = vpack.c.bf16 %v354_v17, %v353_v15  ;;  %4677 = vmatprep.subr.bf16.mxu1 %v5572_v32  ;;  %v367_v15 = vld [vmem:[%s6484_s10 + $0x160] sm:$0xff]  ;;  %v368_v17 = vld [vmem:[%s6484_s10 + $0x168] sm:$0xff] }
 0x121   :  { %4659 = vmatpush3.bf16.msra.mxu0 %v5490_v63  ;;  %v5652_v19 = vpack.c.bf16 %v368_v17, %v367_v15 }
 0x122   :  { %4661 = vmatprep.subr.bf16.mxu0 %v5514_v8  ;;  %6551 = vst [vmem:[#allocation17_spill] sm:$0xff] %v5550_v22 }
 0x123   :  { %4679 = vmatpush3.bf16.msra.mxu1 %v5580_v41  ;;  %6563 = vst [vmem:[#allocation29_spill] sm:$0xff] %v5652_v19 }
 0x124   :  { %4681 = vmatprep.subr.bf16.mxu1 %v5590_v45 }
 0x125   :  { %4663 = vmatpush3.bf16.msra.mxu0 %v5525_v12 }
 0x126   :  { %4665 = vmatprep.subr.bf16.mxu0 %v5550_v22 }
 0x127   :  { %4683 = vmatpush3.bf16.msra.mxu1 %v5598_v54 }
 0x128   :  { %4685 = vmatprep.subr.bf16.mxu1 %v5608_v58 }
 0x129   :  { %4667 = vmatpush3.bf16.msra.mxu0 %v5561_v28 }
 0x12a   :  { %4485 = vmatprep.subr.mxu0 %v5677_v39 }
 0x12b   :  { %4687 = vmatpush3.bf16.msra.mxu1 %v5616_v1 }
 0x12c   :  { %4689 = vmatprep.subr.bf16.mxu1 %v5626_v5 }
 0x12f   :  { %4691 = vmatpush3.bf16.msra.mxu1 %v5634_v10 }
 0x130   :  { %4693 = vmatprep.subr.bf16.mxu1 %v5644_v14 }
 0x133   :  { %4695 = vmatpush3.bf16.msra.mxu1 %v5652_v19 }
 0x134   :  { %4697 = vmatprep.subr.bf16.mxu1 %v5662_v26 }
 0x137   :  { %4699 = vmatpush3.bf16.msra.mxu1 %v5670_v36 }
 0x138   :  { %1471 = vmatprep.subr.bf16.mxu1 %v4981_v42 }
 0x1ae   :  { %v560_v44 = vpop.f32.mrb[8].mxu0  ;;  %v5683_v50 = vpop.f32.mrb[8].mxu1 }
 0x1af   :  { %v562_v51 = vpop.f32.mrb[9].mxu0  ;;  %v5685_v55 = vpop.f32.mrb[9].mxu1 }
 0x1b0   :  { %v564_v57 = vpop.f32.mrb[10].mxu0  ;;  %v5687_v60 = vpop.f32.mrb[10].mxu1 }
 0x1b1   :  { %v566_v62 = vpop.f32.mrb[11].mxu0  ;;  %v5689_v2 = vpop.f32.mrb[11].mxu1 }
 0x1b6   :  { %v570_v3 = vpop.f32.mrb[12].mxu0  ;;  %v5691_v6 = vpop.f32.mrb[12].mxu1 }
 0x1b7   :  { %v572_v7 = vpop.f32.mrb[13].mxu0  ;;  %v5693_v11 = vpop.f32.mrb[13].mxu1 }
 0x1b8   :  { %v574_v13 = vpop.f32.mrb[14].mxu0  ;;  %v5695_v15 = vpop.f32.mrb[14].mxu1 }
 0x1b9   :  { %v576_v17 = vpop.f32.mrb[15].mxu0  ;;  %v5697_v20 = vpop.f32.mrb[15].mxu1 }
 0x1be   :  { %v580_v25 = vpop.f32.mrb[16].mxu0  ;;  %v5699_v29 = vpop.f32.mrb[16].mxu1 }
 0x1bf   :  { %v582_v31 = vpop.f32.mrb[17].mxu0  ;;  %v5701_v42 = vpop.f32.mrb[17].mxu1 }
 0x1c0   :  { %v584_v34 = vpop.f32.mrb[18].mxu0  ;;  %v5703_v33 = vpop.f32.mrb[18].mxu1 }
 0x1c1   :  { %v586_v28 = vpop.f32.mrb[19].mxu0  ;;  %v5705_v22 = vpop.f32.mrb[19].mxu1 }
 0x1c6   :  { %v686_v12 = vpop.f32.mrb[20].mxu0  ;;  %v810_v8 = vpop.f32.mrb[6].mxu1 }
 0x1c7   :  { %v1041_v63 = vmul.f32 %v810_v8, %v560_v44  ;;  %v4462_v36 = vpop.f32.mrb[21].mxu0  ;;  %v812_v59 = vpop.f32.mrb[7].mxu1 }
 0x1c8   :  { %v1042_v56 = vmul.f32 %v812_v59, %v562_v51  ;;  %v689_v26 = vpop.f32.mrb[22].mxu0 }
 0x1c9   :  { %v4463_v19 = vpop.f32.mrb[23].mxu0 }
 0x1ca   :  { %v816_v48 = vpop.f32.mrb[20].mxu1  ;;  %1154 = vmatprep.mubr.f32.mxu0 %v1042_v56 }
 0x1cb   :  { %v1046_v14 = vmul.f32 %v816_v48, %v564_v57  ;;  %v818_v10 = vpop.f32.mrb[21].mxu1  ;;  %1155 = vmatmul.mubr.f32.vlgmr.msra.gmra.mrb[42].mxu0 %v1041_v63 }
 0x1cc   :  { %v1047_v43 = vmul.f32 %v818_v10, %v566_v62  ;;  %4486 = vmatpush3.msra.mxu0 %v5677_v39 }
 0x1cd   :  { %1534 = vmatprep.subr.bf16.mxu0 %v4984_v53 }
 0x1ce   :  { %v694_v40 = vpop.f32.mrb[24].mxu0  ;;  %v822_v8 = vpop.f32.mrb[22].mxu1  ;;  %1159 = vmatprep.mubr.f32.mxu0 %v1047_v43 }
 0x1cf   :  { %v1051_v36 = vmul.f32 %v822_v8, %v570_v3  ;;  %v4466_v59 = vpop.f32.mrb[25].mxu0  ;;  %v824_v44 = vpop.f32.mrb[23].mxu1  ;;  %1160 = vmatmul.mubr.f32.gmra.mrb[44].mxu0 %v1046_v14 }
 0x1d0   :  { %v1052_v19 = vmul.f32 %v824_v44, %v572_v7  ;;  %v697_v51 = vpop.f32.mrb[26].mxu0 }
 0x1d1   :  { %v4467_v5 = vpop.f32.mrb[27].mxu0 }
 0x1d2   :  { %v828_v1 = vpop.f32.mrb[24].mxu1  ;;  %1164 = vmatprep.mubr.f32.mxu0 %v1052_v19 }
 0x1d3   :  { %v1056_v56 = vmul.f32 %v828_v1, %v574_v13  ;;  %v830_v48 = vpop.f32.mrb[25].mxu1  ;;  %1165 = vmatmul.mubr.f32.gmra.mrb[46].mxu0 %v1051_v36 }
 0x1d4   :  { %v1057_v63 = vmul.f32 %v830_v48, %v576_v17 }
 0x1d6   :  { %v5711_v10 = vpop.f32.mrb[28].mxu0  ;;  %v834_v57 = vpop.f32.mrb[26].mxu1  ;;  %1169 = vmatprep.mubr.f32.mxu0 %v1057_v63 }
 0x1d7   :  { %v1061_v53 = vmul.f32 %v834_v57, %v580_v25  ;;  %v4470_v62 = vpop.f32.mrb[29].mxu0  ;;  %v836_v43 = vpop.f32.mrb[27].mxu1  ;;  %1170 = vmatmul.mubr.f32.gmra.mrb[48].mxu0 %v1056_v56 }
 0x1d8   :  { %v1062_v3 = vmul.f32 %v836_v43, %v582_v31  ;;  %v705_v8 = vpop.f32.mrb[30].mxu0 }
 0x1d9   :  { %v4471_v14 = vpop.f32.mrb[31].mxu0 }
 0x1da   :  { %v840_v7 = vpop.f32.mrb[28].mxu1  ;;  %1174 = vmatprep.mubr.f32.mxu0 %v1062_v3 }
 0x1db   :  { %v1066_v5 = vmul.f32 %v840_v7, %v584_v34  ;;  %v842_v59 = vpop.f32.mrb[29].mxu1  ;;  %1175 = vmatmul.mubr.f32.gmra.mrb[50].mxu0 %v1061_v53  ;;  %v4979_v34 = vld [vmem:[%s6482_s8 + $0x64] ss:$20 sps:$4 sm:$0xff]   ;;  %v4985_v7 = vld [vmem:[%s6482_s8 + $0x94] ss:$20 sps:$4 sm:$0xff]  }
 0x1dc   :  { %v1067_v1 = vmul.f32 %v842_v59, %v586_v28  ;;  %v4982_v28 = vld [vmem:[%s6482_s8 + $0x6c] ss:$20 sps:$4 sm:$0xff]  }
 0x1de   :  { %v911_v13 = vpop.f32.mrb[6].mxu0  ;;  %v4478_v36 = vpop.f32.mrb[30].mxu1  ;;  %1179 = vmatprep.mubr.f32.mxu0 %v1067_v1 }
 0x1df   :  { %v1043_v17 = vmul.f32 %v911_v13, %v5683_v50  ;;  %v1050_v44 = vmul.f32 %v4478_v36, %v689_v26  ;;  %v913_v19 = vpop.f32.mrb[7].mxu0  ;;  %v1012_v25 = vpop.f32.mrb[31].mxu1  ;;  %1180 = vmatmul.mubr.f32.gmra.mrb[52].mxu0 %v1066_v5  ;;  %v4987_v50 = vld [vmem:[%s6482_s8 + $0x98] ss:$20 sps:$4 sm:$0xff]   ;;  %v4990_v26 = vld [vmem:[%s6482_s8 + $0x90] ss:$20 sps:$4 sm:$0xff]  }
 0x1e0   :  { %v1044_v31 = vmul.f32 %v913_v19, %v5685_v55  ;;  %v1045_v56 = vmul.f32 %v1012_v25, %v686_v12  ;;  %v3884_v12 = vld [vmem:[%s6482_s8 + $0xbc] sm:$0xff]  ;;  %v3883_v55 = vld [vmem:[%s6482_s8 + $0xb4] sm:$0xff] }
 0x1e1   :  { %v4988_v5 = vld [vmem:[%s6482_s8 + $0x8c] ss:$20 sps:$4 sm:$0xff]   ;;  %v3897_v59 = vcombine.high %v3883_v55, %v3883_v55 }
 0x1e2   :  { %v917_v48 = vpop.f32.mrb[32].mxu0  ;;  %v4481_v63 = vpop.f32.mrb[32].mxu1  ;;  %1249 = vmatprep.mubr.f32.mxu1 %v1044_v31  ;;  %4487 = vmatprep.mubr.msk.f32.mxu0 %vm1071_vm9, %v1045_v56 }
 0x1e3   :  { %v1048_v57 = vmul.f32 %v917_v48, %v5687_v60  ;;  %v1060_v53 = vmul.f32 %v4481_v63, %v697_v51  ;;  %v919_v62 = vpop.f32.mrb[33].mxu0  ;;  %v1022_v43 = vpop.f32.mrb[33].mxu1  ;;  %1250 = vmatmul.mubr.f32.vlgmr.msra.gmra.mrb[36].mxu1 %v1043_v17  ;;  %4488 = vmatmul.mubr.msk.f32.vlgmr.msra.gmra.mrb[54].mxu0 %vm1071_vm9, %v1050_v44  ;;  %v3899_v60 = vcombine.high %v3884_v12, %v3884_v12 }
 0x1e4   :  { %v1049_v3 = vmul.f32 %v919_v62, %v5689_v2  ;;  %v1055_v14 = vmul.f32 %v1022_v43, %v694_v40  ;;  %1472 = vmatpush1.bf16.msra.mxu1 %v4979_v34  ;;  %1535 = vmatpush1.bf16.msra.mxu0 %v4982_v28  ;;  %v3898_v51 = vcombine.low %v3884_v12, %v3884_v12  ;;  %v1659_v62 = vpop.permute.xlu1 %1658 }
 0x1e5   :  { %1536 = vmatprep.subr.bf16.mxu0 %v4987_v50  ;;  %1473 = vmatprep.subr.bf16.mxu1 %v4990_v26  ;;  %v3896_v40 = vcombine.low %v3883_v55, %v3883_v55  ;;  %v6567_v50 = vmov 0.0  }
 0x1e6   :  { %v923_v1 = vpop.f32.mrb[34].mxu0  ;;  %v4484_v13 = vpop.f32.mrb[34].mxu1  ;;  %1254 = vmatprep.mubr.f32.mxu1 %v1049_v3  ;;  %4490 = vmatprep.mubr.msk.f32.mxu0 %vm1071_vm9, %v1055_v14  ;;  %v1463_v31 = vsel %vm72_vm0, %v3898_v51, 0  ;;  %v6571_v51 = vld [vmem:[#allocation6_spill] sm:$0xff]  ;;  %3765 = vst.msk [vmem:[#allocation2 + $0x28] sm:$0xff] %vm3761_vm14, %v6567_v50  ;;  %3762 = vst.msk [vmem:[#allocation2 + $0x10] sm:$0xff] %vm3761_vm14, %v6567_v50 }
 0x1e7   :  { %v1053_v2 = vmul.f32 %v923_v1, %v5691_v6  ;;  %v1070_v36 = vmul.f32 %v4484_v13, %v705_v8  ;;  %v925_v17 = vpop.f32.mrb[35].mxu0  ;;  %v1032_v44 = vpop.f32.mrb[35].mxu1  ;;  %1255 = vmatmul.mubr.f32.gmra.mrb[38].mxu1 %v1048_v57  ;;  %4491 = vmatmul.mubr.msk.f32.gmra.mrb[56].mxu0 %vm1071_vm9, %v1060_v53  ;;  %v1457_v6 = vsel %vm72_vm0, %v3896_v40, 0  ;;  %v6573_v1 = vld [vmem:[#allocation28_spill] sm:$0xff]  ;;  %v6574_v13 = vld [vmem:[#allocation7_spill] sm:$0xff] }
 0x1e8   :  { %v1054_v19 = vmul.f32 %v925_v17, %v5693_v11  ;;  %v1065_v25 = vmul.f32 %v1032_v44, %v5711_v10  ;;  %1537 = vmatpush1.bf16.msra.mxu0 %v4985_v7  ;;  %1474 = vmatpush1.bf16.msra.mxu1 %v4988_v5  ;;  %v6566_v10 = vmov 0   ;;  %v1655_v57 = vpop.permute.xlu0 %1654  ;;  %v1661_v43 = vpop.permute.xlu1 %1660  ;;  %v6568_v7 = vld [vmem:[#allocation25_spill] sm:$0xff]  ;;  %v6569_v5 = vld [vmem:[#allocation26_spill] sm:$0xff]  ;;  %v6575_v40 = vld [vmem:[#allocation8_spill] sm:$0xff] }
 0x1e9   :  { %3905 = vmatprep.subr.msk.bf16.mxu0 %vm72_vm0, %v3899_v60  ;;  %3901 = vmatprep.subr.msk.bf16.mxu1 %vm72_vm0, %v3897_v59  ;;  %v6570_v60 = vld [vmem:[#allocation5_spill] sm:$0xff]  ;;  %v6572_v59 = vld [vmem:[#allocation27_spill] sm:$0xff]  ;;  %v6579_v44 = vld [vmem:[#allocation10_spill] sm:$0xff] }
 0x1ea   :  { %v929_v56 = vpop.f32.mrb[36].mxu0  ;;  %1259 = vmatprep.mubr.f32.mxu1 %v1054_v19  ;;  %4493 = vmatprep.mubr.msk.f32.mxu0 %vm1071_vm9, %v1065_v25  ;;  %v6578_v17 = vld [vmem:[#allocation9_spill] sm:$0xff]  ;;  %v6580_v19 = vld [vmem:[#allocation31_spill] sm:$0xff] }
 0x1eb   :  { %v1058_v8 = vmul.f32 %v929_v56, %v5695_v15  ;;  %v931_v34 = vpop.f32.mrb[37].mxu0  ;;  %1260 = vmatmul.mubr.f32.gmra.mrb[40].mxu1 %v1053_v2  ;;  %4494 = vmatmul.mubr.msk.f32.gmra.mrb[58].mxu0 %vm1071_vm9, %v1070_v36  ;;  %v6576_v2 = vld [vmem:[#allocation29_spill] sm:$0xff]  ;;  %v6577_v36 = vld [vmem:[#allocation30_spill] sm:$0xff]  ;;  %v6581_v25 = vld [vmem:[#allocation11_spill] sm:$0xff] }
 0x1ec   :  { %v1059_v11 = vmul.f32 %v931_v34, %v5697_v20  ;;  %1539 = vmatpush1.bf16.msra.mxu0 %v1463_v31  ;;  %1566 = vmatprep.mubr.bf16.mxu0 %v6566_v10  ;;  %v1657_v53 = vpop.permute.xlu0 %1656  ;;  %v1665_v14 = vpop.permute.xlu1 %1664  ;;  %v6582_v31 = vld [vmem:[#allocation13_spill] sm:$0xff]  ;;  %v6583_v56 = vld [vmem:[#allocation15_spill] sm:$0xff] }
 0x1ed   :  { %1476 = vmatpush1.bf16.msra.mxu1 %v1457_v6  ;;  %4702 = vmatprep.subr.msk.bf16.mxu0 %vm5232_vm5, %v5230_v37  ;;  %v6584_v6 = vld [vmem:[#allocation17_spill] sm:$0xff] }
 0x1ee   :  { %v935_v28 = vpop.f32.mrb[38].mxu0  ;;  %1264 = vmatprep.mubr.f32.mxu1 %v1059_v11  ;;  %4496 = vmatprep.subr.bf16.mxu1 %v6567_v50 }
 0x1ef   :  { %v1063_v15 = vmul.f32 %v935_v28, %v5699_v29  ;;  %v937_v26 = vpop.f32.mrb[39].mxu0  ;;  %1265 = vmatmul.mubr.f32.gmra.mrb[42].mxu1 %v1058_v8  ;;  %3906 = vmatmul.mubr.msk.bf16.vlgmr.msra.gmra.mrb[60].mxu0 %vm501_vm6, %v5254_v46  ;;  %v6585_v8 = vld [vmem:[#allocation19_spill] sm:$0xff] }
 0x1f0   :  { %v1064_v20 = vmul.f32 %v937_v26, %v5701_v42  ;;  %1576 = vmatprep.mubr.bf16.mxu0 %v6566_v10  ;;  %4705 = vmatpush1.bf16.msk.msra.mxu0 %vm5232_vm5, %v5256_v47  ;;  %v4995_v42 = vld [vmem:[%s6482_s8 + $0x74] ss:$20 sps:$4 sm:$0xff]   ;;  %v1663_v3 = vpop.permute.xlu0 %1662 }
 0x1f1   :  { %4714 = vmatprep.subr.msk.bf16.mxu0 %vm5232_vm5, %v5262_v49 }
 0x1f2   :  { %v941_v48 = vpop.f32.mrb[40].mxu0  ;;  %1269 = vmatprep.mubr.f32.mxu1 %v1064_v20 }
 0x1f3   :  { %v1068_v29 = vmul.f32 %v941_v48, %v5703_v33  ;;  %v943_v63 = vpop.f32.mrb[41].mxu0  ;;  %1270 = vmatmul.mubr.f32.gmra.mrb[44].mxu1 %v1063_v15  ;;  %v4996_v33 = vld [vmem:[%s6482_s8 + $0x9c] ss:$20 sps:$4 sm:$0xff]  }
 0x1f4   :  { %v1069_v12 = vmul.f32 %v943_v63, %v5705_v22  ;;  %v4997_v22 = vld [vmem:[%s6482_s8 + $0xc4] ss:$0 sps:$4 sm:$0xff]  }
 0x1f5   :  { %v1469_v55 = vsel %vm72_vm0, %v4997_v22, 0 }
 0x1f6   :  { %1274 = vmatprep.mubr.f32.mxu1 %v1069_v12 }
 0x1f7   :  { %1275 = vmatmul.mubr.f32.gmra.mrb[46].mxu1 %v1068_v29  ;;  %3907 = vmatmul.mubr.msk.bf16.gmra.mrb[64].mxu0 %vm501_vm6, %v5268_v52 }
 0x1f8   :  { %1503 = vmatprep.mubr.bf16.mxu1 %v6566_v10  ;;  %1586 = vmatprep.mubr.bf16.mxu0 %v6566_v10 }
 0x1fb   :  { %3902 = vmatmul.mubr.msk.bf16.vlgmr.msra.gmra.mrb[48].mxu1 %vm501_vm6, %v5254_v46 }
 0x1fc   :  { %4497 = vmatpush3.bf16.msra.mxu1 %v4995_v42  ;;  %1513 = vmatprep.mubr.bf16.mxu1 %v6566_v10 }
 0x1fd   :  { %4498 = vmatprep.subr.bf16.mxu1 %v6567_v50 }
 0x1ff   :  { %3908 = vmatmul.mubr.msk.bf16.gmra.mrb[68].mxu0 %vm501_vm6, %v5290_v61 }
 0x200   :  { %4499 = vmatpush3.bf16.msra.mxu1 %v4996_v33  ;;  %1742 = vmatprep.mubr.f32.mxu0 %v6567_v50 }
 0x201   :  { %4500 = vmatprep.subr.bf16.mxu1 %v6567_v50 }
 0x203   :  { %3903 = vmatmul.mubr.msk.bf16.gmra.mrb[52].mxu1 %vm501_vm6, %v5268_v52 }
 0x204   :  { %1523 = vmatprep.mubr.bf16.mxu1 %v6566_v10  ;;  %4501 = vmatpush3.bf16.msra.mxu1 %v1469_v55 }
 0x205   :  { %4708 = vmatprep.subr.msk.bf16.mxu1 %vm5232_vm5, %v5294_v0 }
 0x207   :  { %3914 = vmatmul.mubr.msk.f32.vlgmr.msra.gmra.mrb[72].mxu0 %vm709_vm8, %v1655_v57 }
 0x208   :  { %1748 = vmatprep.mubr.f32.mxu0 %v6567_v50  ;;  %4717 = vmatpush3.bf16.msk.msra.mxu0 %vm5232_vm5, %v5262_v49 }
 0x209   :  { %4751 = vmatprep.subr.bf16.mxu0 %v5503_v4 }
 0x20b   :  { %3904 = vmatmul.mubr.msk.bf16.gmra.mrb[56].mxu1 %vm501_vm6, %v5290_v61  ;;  %3915 = vmatmul.mubr.msk.f32.gmra.mrb[74].mxu0 %vm709_vm8, %v1657_v53 }
 0x20c   :  { %1754 = vmatprep.mubr.f32.mxu0 %v6567_v50  ;;  %4502 = vmatprep.mubr.msk.bf16.mxu1 %vm5046_vm7, %v6567_v50 }
 0x20f   :  { %3916 = vmatmul.mubr.msk.f32.gmra.mrb[76].mxu0 %vm709_vm8, %v1659_v62 }
 0x210   :  { %1760 = vmatprep.mubr.f32.mxu0 %v6567_v50 }
 0x213   :  { %4503 = vmatmul.mubr.msk.bf16.vlgmr.msra.gmra.mrb[60].mxu1 %vm501_vm6, %v5254_v46  ;;  %3917 = vmatmul.mubr.msk.f32.gmra.mrb[78].mxu0 %vm709_vm8, %v1661_v43 }
 0x214   :  { %4711 = vmatpush1.bf16.msk.msra.mxu1 %vm5232_vm5, %v5327_v18  ;;  %1766 = vmatprep.mubr.f32.mxu0 %v6567_v50 }
 0x215   :  { %4506 = vmatprep.mubr.msk.bf16.mxu1 %vm5046_vm7, %v6567_v50  ;;  %4719 = vmatprep.subr.bf16.mxu1 %v5340_v21 }
 0x217   :  { %3918 = vmatmul.mubr.msk.f32.gmra.mrb[80].mxu0 %vm709_vm8, %v1663_v3 }
 0x218   :  { %1772 = vmatprep.mubr.f32.mxu0 %v6567_v50 }
 0x21b   :  { %4507 = vmatmul.mubr.msk.bf16.gmra.mrb[64].mxu1 %vm501_vm6, %v5268_v52  ;;  %3919 = vmatmul.mubr.msk.f32.gmra.mrb[82].mxu0 %vm709_vm8, %v1665_v14 }
 0x21c   :  { %4518 = vmatprep.mubr.msk.f32.mxu0 %vm709_vm8, %v1655_v57  ;;  %4510 = vmatprep.mubr.msk.bf16.mxu1 %vm5046_vm7, %v6567_v50 }
 0x21f   :  { %4519 = vmatmul.mubr.msk.f32.vlgmr.msra.gmra.mrb[84].mxu0 %vm709_vm8, %v1657_v53 }
 0x220   :  { %4521 = vmatprep.mubr.msk.f32.mxu0 %vm709_vm8, %v1659_v62  ;;  %4753 = vmatpush3.bf16.msra.mxu0 %v5516_v9 }
 0x221   :  { %4755 = vmatprep.subr.bf16.mxu0 %v5539_v16 }
 0x223   :  { %4511 = vmatmul.mubr.msk.bf16.gmra.mrb[68].mxu1 %vm501_vm6, %v5290_v61  ;;  %4522 = vmatmul.mubr.msk.f32.gmra.mrb[86].mxu0 %vm709_vm8, %v1661_v43 }
 0x224   :  { %4524 = vmatprep.mubr.msk.f32.mxu0 %vm709_vm8, %v1663_v3  ;;  %1843 = vmatprep.mubr.f32.mxu1 %v6567_v50 }
 0x225   :  { %4757 = vmatpush3.bf16.msra.mxu0 %v5552_v23 }
 0x226   :  { %4759 = vmatprep.subr.bf16.mxu0 %v5572_v32 }
 0x227   :  { %4525 = vmatmul.mubr.msk.f32.gmra.mrb[88].mxu0 %vm709_vm8, %v1665_v14 }
 0x229   :  { %4761 = vmatpush3.bf16.msra.mxu0 %v5580_v41 }
 0x22a   :  { %4763 = vmatprep.subr.bf16.mxu0 %v5590_v45 }
 0x22b   :  { %3922 = vmatmul.mubr.msk.f32.vlgmr.msra.gmra.mrb[72].mxu1 %vm709_vm8, %v1655_v57 }
 0x22c   :  { %1849 = vmatprep.mubr.f32.mxu1 %v6567_v50  ;;  %4721 = vmatpush3.bf16.msra.mxu1 %v5380_v24 }
 0x22d   :  { %4723 = vmatprep.subr.bf16.mxu1 %v5410_v27  ;;  %4765 = vmatpush3.bf16.msra.mxu0 %v5598_v54 }
 0x22e   :  { %4767 = vmatprep.subr.bf16.mxu0 %v5608_v58 }
 0x22f   :  { %3923 = vmatmul.mubr.msk.f32.gmra.mrb[74].mxu1 %vm709_vm8, %v1657_v53 }
 0x230   :  { %1855 = vmatprep.mubr.f32.mxu1 %v6567_v50  ;;  %4725 = vmatpush3.bf16.msra.mxu1 %v5418_v30 }
 0x231   :  { %4727 = vmatprep.subr.bf16.mxu1 %v5428_v35  ;;  %4769 = vmatpush3.bf16.msra.mxu0 %v6568_v7 }
 0x232   :  { %4771 = vmatprep.subr.bf16.mxu0 %v6569_v5 }
 0x233   :  { %3924 = vmatmul.mubr.msk.f32.gmra.mrb[76].mxu1 %vm709_vm8, %v1659_v62 }
 0x234   :  { %1861 = vmatprep.mubr.f32.mxu1 %v6567_v50  ;;  %4729 = vmatpush3.bf16.msra.mxu1 %v6570_v60 }
 0x235   :  { %4731 = vmatprep.subr.bf16.mxu1 %v6571_v51  ;;  %4773 = vmatpush3.bf16.msra.mxu0 %v6572_v59 }
 0x236   :  { %4775 = vmatprep.subr.bf16.mxu0 %v6573_v1 }
 0x237   :  { %3925 = vmatmul.mubr.msk.f32.gmra.mrb[78].mxu1 %vm709_vm8, %v1661_v43 }
 0x238   :  { %1867 = vmatprep.mubr.f32.mxu1 %v6567_v50  ;;  %4733 = vmatpush3.bf16.msra.mxu1 %v6574_v13 }
 0x239   :  { %4735 = vmatprep.subr.bf16.mxu1 %v6575_v40  ;;  %4777 = vmatpush3.bf16.msra.mxu0 %v6576_v2 }
 0x23a   :  { %4779 = vmatprep.subr.bf16.mxu0 %v6577_v36 }
 0x23b   :  { %3926 = vmatmul.mubr.msk.f32.gmra.mrb[80].mxu1 %vm709_vm8, %v1663_v3 }
 0x23c   :  { %1873 = vmatprep.mubr.f32.mxu1 %v6567_v50  ;;  %4737 = vmatpush3.bf16.msra.mxu1 %v6578_v17 }
 0x23d   :  { %4739 = vmatprep.subr.bf16.mxu1 %v6579_v44  ;;  %4781 = vmatpush3.bf16.msra.mxu0 %v6580_v19 }
 0x23f   :  { %3927 = vmatmul.mubr.msk.f32.gmra.mrb[82].mxu1 %vm709_vm8, %v1665_v14 }
 0x240   :  { %4741 = vmatpush3.bf16.msra.mxu1 %v6581_v25 }
 0x241   :  { %4743 = vmatprep.subr.bf16.mxu1 %v6582_v31 }
 0x244   :  { %4745 = vmatpush3.bf16.msra.mxu1 %v6583_v56 }
 0x245   :  { %4747 = vmatprep.subr.bf16.mxu1 %v6584_v6 }
 0x248   :  { %4749 = vmatpush3.bf16.msra.mxu1 %v6585_v8 }
 0x249   :  { %4527 = vmatprep.subr.mxu1 %v5677_v39 }
 0x29e   :  { %v4092_v34 = vpop.f32.mrb[42].mxu0 }
 0x29f   :  { %v4093_v11 = vpop.f32.mrb[43].mxu0 }
 0x2a0   :  { %v4094_v28 = vadd.f32 %v4093_v11, %v4092_v34 }
 0x2a2   :  { %v4095_v15 = vpop.f32.mrb[44].mxu0 }
 0x2a3   :  { %v4096_v26 = vpop.f32.mrb[45].mxu0 }
 0x2a4   :  { %v4097_v20 = vadd.f32 %v4096_v26, %v4095_v15 }
 0x2a6   :  { %v4098_v48 = vpop.f32.mrb[46].mxu0 }
 0x2a7   :  { %v4099_v29 = vpop.f32.mrb[47].mxu0 }
 0x2a8   :  { %v4100_v63 = vadd.f32 %v4099_v29, %v4098_v48 }
 0x2aa   :  { %v4101_v12 = vpop.f32.mrb[48].mxu0 }
 0x2ab   :  { %v4102_v42 = vpop.f32.mrb[49].mxu0 }
 0x2ac   :  { %v4103_v33 = vadd.f32 %v4102_v42, %v4101_v12 }
 0x2ae   :  { %v4104_v22 = vpop.f32.mrb[50].mxu0 }
 0x2af   :  { %v4105_v55 = vpop.f32.mrb[51].mxu0 }
 0x2b0   :  { %v4106_v57 = vadd.f32 %v4105_v55, %v4104_v22 }
 0x2b2   :  { %v4107_v53 = vpop.f32.mrb[52].mxu0 }
 0x2b3   :  { %v4108_v62 = vpop.f32.mrb[53].mxu0 }
 0x2b4   :  { %v4109_v43 = vadd.f32 %v4108_v62, %v4107_v53 }
 0x2b6   :  { %v4142_v3 = vpop.f32.mrb[36].mxu1  ;;  %v4489_v14 = vpop.f32.mrb[54].mxu0 }
 0x2b7   :  { %v4143_v19 = vpop.f32.mrb[37].mxu1  ;;  %v1346_v36 = vpop.f32.mrb[55].mxu0 }
 0x2b8   :  { %v4144_v34 = vadd.f32 %v4143_v19, %v4142_v3 }
 0x2ba   :  { %v1252_v11 = vadd.f32 %v4144_v34, %v4094_v28  ;;  %v4145_v2 = vpop.f32.mrb[38].mxu1  ;;  %v4492_v15 = vpop.f32.mrb[56].mxu0 }
 0x2bb   :  { %v4146_v26 = vpop.f32.mrb[39].mxu1  ;;  %v1356_v1 = vpop.f32.mrb[57].mxu0 }
 0x2bc   :  { %v5884_v48 = vadd.f32 %v1346_v36, %v1252_v11  ;;  %v4147_v29 = vadd.f32 %v4146_v26, %v4145_v2 }
 0x2be   :  { %6586 = vst [vmem:[#allocation5_spill] sm:$0xff] %v5884_v48  ;;  %v1257_v12 = vadd.f32 %v4147_v29, %v4097_v20  ;;  %v4148_v42 = vpop.f32.mrb[40].mxu1  ;;  %v4495_v59 = vpop.f32.mrb[58].mxu0 }
 0x2bf   :  { %v4149_v22 = vpop.f32.mrb[41].mxu1  ;;  %v1366_v55 = vpop.f32.mrb[59].mxu0 }
 0x2c0   :  { %v5886_v5 = vadd.f32 %v4489_v14, %v1257_v12  ;;  %v4150_v53 = vadd.f32 %v4149_v22, %v4148_v42 }
 0x2c2   :  { %6587 = vst [vmem:[#allocation6_spill] sm:$0xff] %v5886_v5  ;;  %v1262_v62 = vadd.f32 %v4150_v53, %v4100_v63  ;;  %v4151_v7 = vpop.f32.mrb[42].mxu1  ;;  %v5888_v58 = vpop.f32.mrb[60].mxu0 }
 0x2c3   :  { %v4152_v19 = vpop.f32.mrb[43].mxu1  ;;  %v5890_v28 = vpop.f32.mrb[61].mxu0 }
 0x2c4   :  { %v5892_v3 = vadd.f32 %v1356_v1, %v1262_v62  ;;  %v4153_v36 = vadd.f32 %v4152_v19, %v4151_v7  ;;  %v5894_v34 = vpop.f32.mrb[62].mxu0 }
 0x2c5   :  { %v5896_v2 = vpop.f32.mrb[63].mxu0 }
 0x2c6   :  { %6588 = vst [vmem:[#allocation7_spill] sm:$0xff] %v5892_v3  ;;  %v1267_v20 = vadd.f32 %v4153_v36, %v4103_v33  ;;  %v4154_v11 = vpop.f32.mrb[44].mxu1 }
 0x2c7   :  { %v4155_v26 = vpop.f32.mrb[45].mxu1 }
 0x2c8   :  { %v5898_v14 = vadd.f32 %v4492_v15, %v1267_v20  ;;  %v4156_v29 = vadd.f32 %v4155_v26, %v4154_v11 }
 0x2ca   :  { %6589 = vst [vmem:[#allocation8_spill] sm:$0xff] %v5898_v14  ;;  %v1272_v63 = vadd.f32 %v4156_v29, %v4106_v57  ;;  %v4157_v12 = vpop.f32.mrb[46].mxu1  ;;  %v5900_v42 = vpop.f32.mrb[64].mxu0 }
 0x2cb   :  { %v4158_v22 = vpop.f32.mrb[47].mxu1  ;;  %v5902_v53 = vpop.f32.mrb[65].mxu0 }
 0x2cc   :  { %v5904_v1 = vadd.f32 %v1366_v55, %v1272_v63  ;;  %v4159_v7 = vadd.f32 %v4158_v22, %v4157_v12  ;;  %v5906_v62 = vpop.f32.mrb[66].mxu0 }
 0x2cd   :  { %v5908_v19 = vpop.f32.mrb[67].mxu0 }
 0x2ce   :  { %6590 = vst [vmem:[#allocation9_spill] sm:$0xff] %v5904_v1  ;;  %v1277_v33 = vadd.f32 %v4159_v7, %v4109_v43  ;;  %v1505_v36 = vpop.f32.mrb[48].mxu1 }
 0x2cf   :  { %v1507_v3 = vpop.f32.mrb[49].mxu1 }
 0x2d0   :  { %v5910_v15 = vadd.f32 %v4495_v59, %v1277_v33  ;;  %v1509_v20 = vpop.f32.mrb[50].mxu1  ;;  %v5000_v59 = vld [vmem:[%s6482_s8 + $0xcc] ss:$20 sps:$4 sm:$0xff]  }
 0x2d1   :  { %v1511_v57 = vpop.f32.mrb[51].mxu1 }
 0x2d2   :  { %6591 = vst [vmem:[#allocation10_spill] sm:$0xff] %v5910_v15  ;;  %v5912_v11 = vpop.f32.mrb[68].mxu0 }
 0x2d3   :  { %v5914_v26 = vpop.f32.mrb[69].mxu0 }
 0x2d4   :  { %v5916_v29 = vpop.f32.mrb[70].mxu0 }
 0x2d5   :  { %v5918_v55 = vpop.f32.mrb[71].mxu0 }
 0x2d6   :  { %v1515_v63 = vpop.f32.mrb[52].mxu1 }
 0x2d7   :  { %v1517_v12 = vpop.f32.mrb[53].mxu1 }
 0x2d8   :  { %v1519_v22 = vpop.f32.mrb[54].mxu1 }
 0x2d9   :  { %v1521_v1 = vpop.f32.mrb[55].mxu1 }
 0x2da   :  { %v1744_v14 = vpop.f32.mrb[72].mxu0 }
 0x2db   :  { %v1975_v43 = vmul.f32 %v1744_v14, %v1505_v36  ;;  %v1746_v7 = vpop.f32.mrb[73].mxu0 }
 0x2dc   :  { %v1976_v48 = vmul.f32 %v1746_v7, %v1507_v3 }
 0x2de   :  { %v1525_v33 = vpop.f32.mrb[56].mxu1  ;;  %v1750_v15 = vpop.f32.mrb[74].mxu0  ;;  %2087 = vmatprep.mubr.f32.mxu1 %v1976_v48 }
 0x2df   :  { %v1980_v5 = vmul.f32 %v1750_v15, %v1509_v20  ;;  %v1527_v54 = vpop.f32.mrb[57].mxu1  ;;  %v1752_v45 = vpop.f32.mrb[75].mxu0  ;;  %2088 = vmatmul.mubr.f32.vlgmr.msra.gmra.mrb[84].mxu1 %v1975_v43 }
 0x2e0   :  { %v1981_v41 = vmul.f32 %v1752_v45, %v1511_v57  ;;  %v1529_v32 = vpop.f32.mrb[58].mxu1  ;;  %4528 = vmatpush3.msra.mxu1 %v5677_v39 }
 0x2e1   :  { %v1531_v23 = vpop.f32.mrb[59].mxu1  ;;  %2523 = vmatprep.subr.bf16.mxu1 %v5000_v59 }
 0x2e2   :  { %v1756_v14 = vpop.f32.mrb[76].mxu0  ;;  %2092 = vmatprep.mubr.f32.mxu1 %v1981_v41 }
 0x2e3   :  { %v1985_v3 = vmul.f32 %v1756_v14, %v1515_v63  ;;  %v1758_v36 = vpop.f32.mrb[77].mxu0  ;;  %2093 = vmatmul.mubr.f32.gmra.mrb[86].mxu1 %v1980_v5 }
 0x2e4   :  { %v1986_v7 = vmul.f32 %v1758_v36, %v1517_v12 }
 0x2e6   :  { %v1631_v16 = vpop.f32.mrb[60].mxu1  ;;  %v1762_v9 = vpop.f32.mrb[78].mxu0  ;;  %2097 = vmatprep.mubr.f32.mxu1 %v1986_v7 }
 0x2e7   :  { %v1990_v48 = vmul.f32 %v1762_v9, %v1519_v22  ;;  %v4504_v15 = vpop.f32.mrb[61].mxu1  ;;  %v1764_v20 = vpop.f32.mrb[79].mxu0  ;;  %2098 = vmatmul.mubr.f32.gmra.mrb[88].mxu1 %v1985_v3 }
 0x2e8   :  { %v1991_v43 = vmul.f32 %v1764_v20, %v1521_v1  ;;  %v1634_v45 = vpop.f32.mrb[62].mxu1 }
 0x2e9   :  { %v4505_v57 = vpop.f32.mrb[63].mxu1 }
 0x2ea   :  { %v1768_v4 = vpop.f32.mrb[80].mxu0  ;;  %2102 = vmatprep.mubr.f32.mxu1 %v1991_v43 }
 0x2eb   :  { %v1995_v39 = vmul.f32 %v1768_v4, %v1525_v33  ;;  %v1770_v59 = vpop.f32.mrb[81].mxu0  ;;  %2103 = vmatmul.mubr.f32.gmra.mrb[90].mxu1 %v1990_v48  ;;  %v4998_v4 = vld [vmem:[%s6482_s8 + $0xc8] ss:$20 sps:$4 sm:$0xff]  }
 0x2ec   :  { %v1996_v41 = vmul.f32 %v1770_v59, %v1527_v54 }
 0x2ee   :  { %v1639_v63 = vpop.f32.mrb[64].mxu1  ;;  %v1774_v14 = vpop.f32.mrb[82].mxu0  ;;  %2107 = vmatprep.mubr.f32.mxu1 %v1996_v41 }
 0x2ef   :  { %v2000_v5 = vmul.f32 %v1774_v14, %v1529_v32  ;;  %v4508_v12 = vpop.f32.mrb[65].mxu1  ;;  %v1776_v36 = vpop.f32.mrb[83].mxu0  ;;  %2108 = vmatmul.mubr.f32.gmra.mrb[92].mxu1 %v1995_v39  ;;  %v5003_v32 = vld [vmem:[%s6482_s8 + $0xf4] ss:$20 sps:$4 sm:$0xff]   ;;  %v5001_v39 = vld [vmem:[%s6482_s8 + $0xf0] ss:$20 sps:$4 sm:$0xff]  }
 0x2f0   :  { %v2001_v9 = vmul.f32 %v1776_v36, %v1531_v23  ;;  %v1642_v22 = vpop.f32.mrb[66].mxu1  ;;  %v3959_v23 = vld [vmem:[%s6482_s8 + $0x118] sm:$0xff] }
 0x2f1   :  { %v4509_v7 = vpop.f32.mrb[67].mxu1  ;;  %v3973_v41 = vcombine.high %v3959_v23, %v3959_v23  ;;  %v3972_v14 = vcombine.low %v3959_v23, %v3959_v23 }
 0x2f2   :  { %v4520_v3 = vpop.f32.mrb[84].mxu0  ;;  %2112 = vmatprep.mubr.f32.mxu1 %v2001_v9 }
 0x2f3   :  { %v1984_v1 = vmul.f32 %v4520_v3, %v1634_v45  ;;  %v1946_v15 = vpop.f32.mrb[85].mxu0  ;;  %2113 = vmatmul.mubr.f32.gmra.mrb[94].mxu1 %v2000_v5 }
 0x2f4   :  { %v1979_v20 = vmul.f32 %v1946_v15, %v1631_v16  ;;  %v5006_v15 = vld [vmem:[%s6482_s8 + $0xd8] ss:$20 sps:$4 sm:$0xff]  }
 0x2f6   :  { %v1647_v54 = vpop.f32.mrb[68].mxu1  ;;  %v4523_v33 = vpop.f32.mrb[86].mxu0  ;;  %4529 = vmatprep.mubr.msk.f32.mxu1 %vm1071_vm9, %v1979_v20 }
 0x2f7   :  { %v1994_v48 = vmul.f32 %v4523_v33, %v1642_v22  ;;  %v4512_v43 = vpop.f32.mrb[69].mxu1  ;;  %v1956_v45 = vpop.f32.mrb[87].mxu0  ;;  %4530 = vmatmul.mubr.msk.f32.vlgmr.msra.gmra.mrb[96].mxu1 %vm1071_vm9, %v1984_v1 }
 0x2f8   :  { %v1989_v16 = vmul.f32 %v1956_v45, %v1639_v63  ;;  %v1650_v57 = vpop.f32.mrb[70].mxu1  ;;  %2524 = vmatpush1.bf16.msra.mxu1 %v4998_v4  ;;  %v2509_v63 = vsel %vm72_vm0, %v3972_v14, 0 }
 0x2f9   :  { %v4513_v59 = vpop.f32.mrb[71].mxu1  ;;  %2525 = vmatprep.subr.bf16.mxu1 %v5003_v32 }
 0x2fa   :  { %v4526_v5 = vpop.f32.mrb[88].mxu0  ;;  %4532 = vmatprep.mubr.msk.f32.mxu1 %vm1071_vm9, %v1989_v16 }
 0x2fb   :  { %v2004_v12 = vmul.f32 %v4526_v5, %v1650_v57  ;;  %v1966_v36 = vpop.f32.mrb[89].mxu0  ;;  %4533 = vmatmul.mubr.msk.f32.gmra.mrb[98].mxu1 %vm1071_vm9, %v1994_v48 }
 0x2fc   :  { %v1999_v9 = vmul.f32 %v1966_v36, %v1647_v54  ;;  %2526 = vmatpush1.bf16.msra.mxu1 %v5001_v39 }
 0x2fd   :  { %3977 = vmatprep.subr.msk.bf16.mxu1 %vm72_vm0, %v3973_v41 }
 0x2fe   :  { %v1845_v22 = vpop.f32.mrb[72].mxu1  ;;  %4535 = vmatprep.mubr.msk.f32.mxu1 %vm1071_vm9, %v1999_v9 }
 0x2ff   :  { %v1977_v7 = vmul.f32 %v1845_v22, %v5888_v58  ;;  %v1847_v3 = vpop.f32.mrb[73].mxu1  ;;  %4536 = vmatmul.mubr.msk.f32.gmra.mrb[100].mxu1 %vm1071_vm9, %v2004_v12 }
 0x300   :  { %v1978_v1 = vmul.f32 %v1847_v3, %v5890_v28  ;;  %2528 = vmatpush1.bf16.msra.mxu1 %v2509_v63  ;;  %2555 = vmatprep.mubr.bf16.mxu1 %v6566_v10  ;;  %v5007_v28 = vld [vmem:[%s6482_s8 + $0x100] ss:$20 sps:$4 sm:$0xff]  }
 0x301   :  { %4557 = vmatprep.subr.bf16.mxu1 %v6567_v50 }
 0x302   :  { %v1851_v20 = vpop.f32.mrb[74].mxu1  ;;  %2182 = vmatprep.mubr.f32.mxu0 %v1978_v1 }
 0x303   :  { %v1982_v4 = vmul.f32 %v1851_v20, %v5894_v34  ;;  %v1853_v32 = vpop.f32.mrb[75].mxu1  ;;  %2183 = vmatmul.mubr.f32.vlgmr.msra.gmra.mrb[90].mxu0 %v1977_v7  ;;  %3978 = vmatmul.mubr.msk.bf16.vlgmr.msra.gmra.mrb[104].mxu1 %vm501_vm6, %v5254_v46  ;;  %v5008_v34 = vld [vmem:[%s6482_s8 + $0x128] ss:$0 sps:$4 sm:$0xff]  }
 0x304   :  { %v1983_v58 = vmul.f32 %v1853_v32, %v5896_v2  ;;  %2565 = vmatprep.mubr.bf16.mxu1 %v6566_v10  ;;  %4558 = vmatpush3.bf16.msra.mxu1 %v5006_v15  ;;  %v2521_v48 = vsel %vm72_vm0, %v5008_v34, 0 }
 0x305   :  { %4559 = vmatprep.subr.bf16.mxu1 %v6567_v50 }
 0x306   :  { %v1857_v54 = vpop.f32.mrb[76].mxu1  ;;  %2187 = vmatprep.mubr.f32.mxu0 %v1983_v58 }
 0x307   :  { %v1987_v33 = vmul.f32 %v1857_v54, %v5900_v42  ;;  %v1859_v23 = vpop.f32.mrb[77].mxu1  ;;  %2188 = vmatmul.mubr.f32.gmra.mrb[92].mxu0 %v1982_v4 }
 0x308   :  { %v1988_v2 = vmul.f32 %v1859_v23, %v5902_v53  ;;  %4560 = vmatpush3.bf16.msra.mxu1 %v5007_v28 }
 0x309   :  { %4561 = vmatprep.subr.bf16.mxu1 %v6567_v50 }
 0x30a   :  { %v1863_v43 = vpop.f32.mrb[78].mxu1  ;;  %2192 = vmatprep.mubr.f32.mxu0 %v1988_v2 }
 0x30b   :  { %v1992_v45 = vmul.f32 %v1863_v43, %v5906_v62  ;;  %v1865_v16 = vpop.f32.mrb[79].mxu1  ;;  %2193 = vmatmul.mubr.f32.gmra.mrb[94].mxu0 %v1987_v33  ;;  %3979 = vmatmul.mubr.msk.bf16.gmra.mrb[108].mxu1 %vm501_vm6, %v5268_v52 }
 0x30c   :  { %v1993_v42 = vmul.f32 %v1865_v16, %v5908_v19  ;;  %2575 = vmatprep.mubr.bf16.mxu1 %v6566_v10  ;;  %4562 = vmatpush3.bf16.msra.mxu1 %v2521_v48 }
 0x30d   :  { %4798 = vmatprep.subr.msk.bf16.mxu1 %vm5232_vm5, %v5294_v0  ;;  %v5998_v0 = vpop.permute.xlu0 %2706 }
 0x30e   :  { %v1869_v53 = vpop.f32.mrb[80].mxu1  ;;  %2197 = vmatprep.mubr.f32.mxu0 %v1993_v42 }
 0x30f   :  { %v1997_v57 = vmul.f32 %v1869_v53, %v5912_v11  ;;  %v1871_v39 = vpop.f32.mrb[81].mxu1  ;;  %2198 = vmatmul.mubr.f32.gmra.mrb[96].mxu0 %v1992_v45 }
 0x310   :  { %v1998_v62 = vmul.f32 %v1871_v39, %v5914_v26 }
 0x312   :  { %v1875_v59 = vpop.f32.mrb[82].mxu1  ;;  %2202 = vmatprep.mubr.f32.mxu0 %v1998_v62 }
 0x313   :  { %v2002_v41 = vmul.f32 %v1875_v59, %v5916_v29  ;;  %v1877_v19 = vpop.f32.mrb[83].mxu1  ;;  %2203 = vmatmul.mubr.f32.gmra.mrb[98].mxu0 %v1997_v57  ;;  %3980 = vmatmul.mubr.msk.bf16.gmra.mrb[112].mxu1 %vm501_vm6, %v5290_v61 }
 0x314   :  { %v2003_v14 = vmul.f32 %v1877_v19, %v5918_v55  ;;  %4563 = vmatprep.mubr.msk.bf16.mxu1 %vm5046_vm7, %v6567_v50 }
 0x316   :  { %2207 = vmatprep.mubr.f32.mxu0 %v2003_v14 }
 0x317   :  { %2208 = vmatmul.mubr.f32.gmra.mrb[100].mxu0 %v2002_v41 }
 0x31b   :  { %4564 = vmatmul.mubr.msk.bf16.vlgmr.msra.gmra.mrb[116].mxu1 %vm501_vm6, %v5254_v46 }
 0x31c   :  { %4567 = vmatprep.mubr.msk.bf16.mxu1 %vm5046_vm7, %v6567_v50  ;;  %4801 = vmatpush1.bf16.msk.msra.mxu1 %vm5232_vm5, %v5327_v18  ;;  %v6005_v18 = vpop.permute.xlu1 %2708 }
 0x31d   :  { %4809 = vmatprep.subr.bf16.mxu1 %v5340_v21  ;;  %v6012_v21 = vpop.permute.xlu0 %2710 }
 0x323   :  { %4568 = vmatmul.mubr.msk.bf16.gmra.mrb[120].mxu1 %vm501_vm6, %v5268_v52 }
 0x324   :  { %4571 = vmatprep.mubr.msk.bf16.mxu1 %vm5046_vm7, %v6567_v50 }
 0x32b   :  { %4572 = vmatmul.mubr.msk.bf16.gmra.mrb[124].mxu1 %vm501_vm6, %v5290_v61 }
 0x32c   :  { %2895 = vmatprep.mubr.f32.mxu1 %v6567_v50 }
 0x333   :  { %3998 = vmatmul.mubr.msk.f32.vlgmr.msra.gmra.mrb[102].mxu1 %vm709_vm8, %v5998_v0 }
 0x334   :  { %2901 = vmatprep.mubr.f32.mxu1 %v6567_v50  ;;  %4811 = vmatpush3.bf16.msra.mxu1 %v5380_v24  ;;  %v6019_v24 = vpop.permute.xlu1 %2712 }
 0x335   :  { %4813 = vmatprep.subr.bf16.mxu1 %v5410_v27  ;;  %v6026_v27 = vpop.permute.xlu0 %2714 }
 0x337   :  { %3999 = vmatmul.mubr.msk.f32.gmra.mrb[128].mxu1 %vm709_vm8, %v6005_v18 }
 0x338   :  { %2907 = vmatprep.mubr.f32.mxu1 %v6567_v50  ;;  %4815 = vmatpush3.bf16.msra.mxu1 %v5418_v30  ;;  %v6033_v30 = vpop.permute.xlu1 %2716 }
 0x339   :  { %4817 = vmatprep.subr.bf16.mxu1 %v5428_v35  ;;  %v388_v35 = vld [vmem:[%s6485_s11] sm:$0xff] }
 0x33b   :  { %4000 = vmatmul.mubr.msk.f32.gmra.mrb[130].mxu1 %vm709_vm8, %v6012_v21 }
 0x33c   :  { %2913 = vmatprep.mubr.f32.mxu1 %v6567_v50  ;;  %4819 = vmatpush3.bf16.msra.mxu1 %v6570_v60  ;;  %v389_v60 = vld [vmem:[%s6485_s11 + $0x8] sm:$0xff] }
 0x33d   :  { %4821 = vmatprep.subr.bf16.mxu1 %v6571_v51  ;;  %v4782_v51 = vpack.c.bf16 %v389_v60, %v388_v35  ;;  %v5009_v60 = vld [vmem:[%s6482_s8 + $0xd0] ss:$20 sps:$4 sm:$0xff]  }
 0x33f   :  { %4001 = vmatmul.mubr.msk.f32.gmra.mrb[132].mxu1 %vm709_vm8, %v6019_v24  ;;  %4783 = vmatprep.subr.bf16.mxu0 %v4782_v51 }
 0x340   :  { %2919 = vmatprep.mubr.f32.mxu1 %v6567_v50  ;;  %4823 = vmatpush3.bf16.msra.mxu1 %v6574_v13  ;;  %v6051_v13 = vld [vmem:[%s6484_s10 + $0x200] sm:$0xff] }
 0x341   :  { %4825 = vmatprep.subr.bf16.mxu1 %v6575_v40  ;;  %4785 = vmatpush3.bf16.msra.mxu0 %v4782_v51  ;;  %v390_v40 = vld [vmem:[%s6485_s11 + $0x10] sm:$0xff] }
 0x343   :  { %4002 = vmatmul.mubr.msk.f32.gmra.mrb[134].mxu1 %vm709_vm8, %v6026_v27 }
 0x344   :  { %2925 = vmatprep.mubr.f32.mxu1 %v6567_v50  ;;  %4827 = vmatpush3.bf16.msra.mxu1 %v6578_v17  ;;  %v391_v17 = vld [vmem:[%s6485_s11 + $0x18] sm:$0xff] }
 0x345   :  { %4829 = vmatprep.subr.bf16.mxu1 %v6579_v44  ;;  %v4786_v44 = vpack.c.bf16 %v391_v17, %v390_v40 }
 0x347   :  { %4003 = vmatmul.mubr.msk.f32.gmra.mrb[136].mxu1 %vm709_vm8, %v6033_v30  ;;  %4787 = vmatprep.subr.bf16.mxu0 %v4786_v44 }
 0x348   :  { %4831 = vmatpush3.bf16.msra.mxu1 %v6581_v25  ;;  %4789 = vmatpush3.bf16.msra.mxu0 %v4786_v44  ;;  %v392_v25 = vld [vmem:[%s6485_s11 + $0x20] sm:$0xff]  ;;  %v5014_v44 = vld [vmem:[%s6482_s8 + $0xfc] ss:$20 sps:$4 sm:$0xff]  }
 0x349   :  { %4833 = vmatprep.subr.bf16.mxu1 %v6582_v31  ;;  %4546 = vmatprep.subr.mxu0 %v392_v25  ;;  %v5011_v31 = vld [vmem:[%s6482_s8 + $0xd4] ss:$20 sps:$4 sm:$0xff]  }
 0x34c   :  { %4835 = vmatpush3.bf16.msra.mxu1 %v6583_v56  ;;  %4547 = vmatpush3.msra.mxu0 %v392_v25 }
 0x34d   :  { %4837 = vmatprep.subr.bf16.mxu1 %v6584_v6  ;;  %2586 = vmatprep.subr.bf16.mxu0 %v5011_v31  ;;  %v3960_v31 = vld [vmem:[%s6482_s8 + $0x120] sm:$0xff] }
 0x350   :  { %4839 = vmatpush3.bf16.msra.mxu1 %v6585_v8 }
 0x351   :  { %4588 = vmatprep.subr.mxu1 %v6051_v13 }
 0x3b2   :  { %v4213_v56 = vpop.f32.mrb[84].mxu1 }
 0x3b3   :  { %v4214_v6 = vpop.f32.mrb[85].mxu1 }
 0x3b4   :  { %v4215_v8 = vadd.f32 %v4214_v6, %v4213_v56 }
 0x3b6   :  { %v4216_v11 = vpop.f32.mrb[86].mxu1 }
 0x3b7   :  { %v4217_v26 = vpop.f32.mrb[87].mxu1 }
 0x3b8   :  { %v4218_v29 = vadd.f32 %v4217_v26, %v4216_v11  ;;  %v5012_v11 = vld [vmem:[%s6482_s8 + $0xf8] ss:$20 sps:$4 sm:$0xff]  }
 0x3ba   :  { %v4219_v55 = vpop.f32.mrb[88].mxu1 }
 0x3bb   :  { %v4220_v5 = vpop.f32.mrb[89].mxu1 }
 0x3bc   :  { %v4221_v12 = vadd.f32 %v4220_v5, %v4219_v55  ;;  %v3975_v55 = vcombine.high %v3960_v31, %v3960_v31  ;;  %v3974_v5 = vcombine.low %v3960_v31, %v3960_v31 }
 0x3be   :  { %v4222_v36 = vpop.f32.mrb[90].mxu1 }
 0x3bf   :  { %v4223_v9 = vpop.f32.mrb[91].mxu1 }
 0x3c0   :  { %v4224_v63 = vadd.f32 %v4223_v9, %v4222_v36 }
 0x3c2   :  { %v4225_v22 = vpop.f32.mrb[92].mxu1 }
 0x3c3   :  { %v4226_v7 = vpop.f32.mrb[93].mxu1 }
 0x3c4   :  { %v4227_v3 = vadd.f32 %v4226_v7, %v4225_v22 }
 0x3c6   :  { %v4228_v1 = vpop.f32.mrb[94].mxu1 }
 0x3c7   :  { %v4229_v15 = vpop.f32.mrb[95].mxu1 }
 0x3c8   :  { %v6066_v20 = vadd.f32 %v4229_v15, %v4228_v1 }
 0x3ca   :  { %v4531_v4 = vpop.f32.mrb[96].mxu1 }
 0x3cb   :  { %v2279_v32 = vpop.f32.mrb[97].mxu1 }
 0x3ce   :  { %v4534_v58 = vpop.f32.mrb[98].mxu1 }
 0x3cf   :  { %v2289_v28 = vpop.f32.mrb[99].mxu1 }
 0x3d2   :  { %v6068_v34 = vpop.f32.mrb[100].mxu1 }
 0x3d3   :  { %v2299_v54 = vpop.f32.mrb[101].mxu1 }
 0x3d6   :  { %v4263_v33 = vpop.f32.mrb[90].mxu0  ;;  %v6070_v23 = vpop.f32.mrb[104].mxu1 }
 0x3d7   :  { %v4264_v2 = vpop.f32.mrb[91].mxu0  ;;  %v6072_v48 = vpop.f32.mrb[105].mxu1 }
 0x3d8   :  { %v4265_v43 = vadd.f32 %v4264_v2, %v4263_v33  ;;  %v6074_v45 = vpop.f32.mrb[106].mxu1 }
 0x3d9   :  { %v6076_v16 = vpop.f32.mrb[107].mxu1 }
 0x3da   :  { %v2185_v42 = vadd.f32 %v4265_v43, %v4215_v8  ;;  %v4266_v53 = vpop.f32.mrb[92].mxu0 }
 0x3db   :  { %v4267_v57 = vpop.f32.mrb[93].mxu0 }
 0x3dc   :  { %v2280_v39 = vadd.f32 %v2279_v32, %v2185_v42  ;;  %v4268_v62 = vadd.f32 %v4267_v57, %v4266_v53  ;;  %v2515_v32 = vsel %vm72_vm0, %v3974_v5, 0  ;;  %v6601_v5 = vld [vmem:[#allocation25_spill] sm:$0xff] }
 0x3de   :  { %v2190_v59 = vadd.f32 %v4268_v62, %v4218_v29  ;;  %v4269_v41 = vpop.f32.mrb[94].mxu0  ;;  %4548 = vmatprep.mubr.msk.f32.mxu0 %vm501_vm6, %v2280_v39  ;;  %v6079_v19 = vpop.f32.mrb[108].mxu1 }
 0x3df   :  { %v4270_v14 = vpop.f32.mrb[95].mxu0  ;;  %v6081_v35 = vpop.f32.mrb[109].mxu1 }
 0x3e0   :  { %v2285_v51 = vadd.f32 %v4531_v4, %v2190_v59  ;;  %v4271_v40 = vadd.f32 %v4270_v14, %v4269_v41  ;;  %v6086_v17 = vpop.f32.mrb[110].mxu1 }
 0x3e1   :  { %v6091_v25 = vpop.f32.mrb[111].mxu1 }
 0x3e2   :  { %v2195_v56 = vadd.f32 %v4271_v40, %v4221_v12  ;;  %v4272_v6 = vpop.f32.mrb[96].mxu0  ;;  %4549 = vmatmul.mubr.msk.f32.vlgmr.msra.gmra.mrb[102].mxu0 %vm501_vm6, %v2285_v51  ;;  %v6592_v40 = vld [vmem:[#allocation12_spill] sm:$0xff] }
 0x3e3   :  { %v4273_v8 = vpop.f32.mrb[97].mxu0  ;;  %2587 = vmatpush1.bf16.msra.mxu0 %v5009_v60 }
 0x3e4   :  { %v2290_v26 = vadd.f32 %v2289_v28, %v2195_v56  ;;  %v4274_v29 = vadd.f32 %v4273_v8, %v4272_v6  ;;  %2588 = vmatprep.subr.bf16.mxu0 %v5014_v44  ;;  %v6593_v8 = vld [vmem:[#allocation14_spill] sm:$0xff] }
 0x3e6   :  { %v2200_v36 = vadd.f32 %v4274_v29, %v4224_v63  ;;  %v4275_v9 = vpop.f32.mrb[98].mxu0  ;;  %4551 = vmatprep.mubr.msk.f32.mxu0 %vm501_vm6, %v2290_v26  ;;  %v6101_v22 = vpop.f32.mrb[112].mxu1  ;;  %v6595_v26 = vld [vmem:[#allocation18_spill] sm:$0xff]  ;;  %v6596_v29 = vld [vmem:[#allocation20_spill] sm:$0xff] }
 0x3e7   :  { %v4276_v12 = vpop.f32.mrb[99].mxu0  ;;  %v6103_v7 = vpop.f32.mrb[113].mxu1  ;;  %2589 = vmatpush1.bf16.msra.mxu0 %v5012_v11  ;;  %v6594_v11 = vld [vmem:[#allocation16_spill] sm:$0xff] }
 0x3e8   :  { %v2295_v1 = vadd.f32 %v4534_v58, %v2200_v36  ;;  %v4277_v15 = vadd.f32 %v4276_v12, %v4275_v9  ;;  %v6105_v4 = vpop.f32.mrb[114].mxu1  ;;  %3981 = vmatprep.subr.msk.bf16.mxu0 %vm72_vm0, %v3975_v55  ;;  %v6600_v55 = vld [vmem:[#allocation24_spill] sm:$0xff]  ;;  %v6605_v9 = vld [vmem:[#allocation29_spill] sm:$0xff]  ;;  %v6606_v12 = vld [vmem:[#allocation30_spill] sm:$0xff] }
 0x3e9   :  { %v6109_v28 = vpop.f32.mrb[115].mxu1  ;;  %v6604_v36 = vld [vmem:[#allocation28_spill] sm:$0xff] }
 0x3ea   :  { %v2205_v63 = vadd.f32 %v4277_v15, %v4227_v3  ;;  %v4278_v33 = vpop.f32.mrb[100].mxu0  ;;  %4552 = vmatmul.mubr.msk.f32.gmra.mrb[104].mxu0 %vm501_vm6, %v2295_v1  ;;  %v394_v1 = vld [vmem:[%s6476_s2 + $0x8] sm:$0xff]  ;;  %v393_v15 = vld [vmem:[%s6476_s2] sm:$0xff] }
 0x3eb   :  { %v4279_v2 = vpop.f32.mrb[101].mxu0  ;;  %2591 = vmatpush1.bf16.msra.mxu0 %v2515_v32 }
 0x3ec   :  { %v2300_v43 = vadd.f32 %v2299_v54, %v2205_v63  ;;  %v4280_v42 = vadd.f32 %v4279_v2, %v4278_v33  ;;  %4792 = vmatprep.subr.msk.bf16.mxu0 %vm5232_vm5, %v5230_v37 }
 0x3ee   :  { %v2210_v58 = vadd.f32 %v4280_v42, %v6066_v20  ;;  %4554 = vmatprep.mubr.msk.f32.mxu0 %vm501_vm6, %v2300_v43  ;;  %v6117_v53 = vpop.f32.mrb[116].mxu1  ;;  %v396_v42 = vld [vmem:[%s6476_s2 + $0x18] sm:$0xff] }
 0x3ef   :  { %v4565_v57 = vpop.f32.mrb[117].mxu1 }
 0x3f0   :  { %v2305_v3 = vadd.f32 %v6068_v34, %v2210_v58  ;;  %v6120_v39 = vpop.f32.mrb[118].mxu1  ;;  %v395_v58 = vld [vmem:[%s6476_s2 + $0x10] sm:$0xff] }
 0x3f1   :  { %v4566_v62 = vpop.f32.mrb[119].mxu1 }
 0x3f2   :  { %4555 = vmatmul.mubr.msk.f32.gmra.mrb[106].mxu0 %vm501_vm6, %v2305_v3 }
 0x3f3   :  { %2618 = vmatprep.mubr.bf16.mxu0 %v6566_v10 }
 0x3f6   :  { %3982 = vmatmul.mubr.msk.bf16.vlgmr.msra.gmra.mrb[108].mxu0 %vm501_vm6, %v5254_v46  ;;  %v6126_v37 = vpop.f32.mrb[120].mxu1 }
 0x3f7   :  { %4795 = vmatpush1.bf16.msk.msra.mxu0 %vm5232_vm5, %v5256_v47  ;;  %v4569_v20 = vpop.f32.mrb[121].mxu1  ;;  %2628 = vmatprep.mubr.bf16.mxu0 %v6566_v10 }
 0x3f8   :  { %v6132_v34 = vpop.f32.mrb[122].mxu1  ;;  %4804 = vmatprep.subr.msk.bf16.mxu0 %vm5232_vm5, %v5262_v49 }
 0x3f9   :  { %v4570_v54 = vpop.f32.mrb[123].mxu1 }
 0x3fe   :  { %3983 = vmatmul.mubr.msk.bf16.gmra.mrb[112].mxu0 %vm501_vm6, %v5268_v52  ;;  %v6139_v46 = vpop.f32.mrb[124].mxu1 }
 0x3ff   :  { %v4573_v59 = vpop.f32.mrb[125].mxu1  ;;  %2638 = vmatprep.mubr.bf16.mxu0 %v6566_v10 }
 0x400   :  { %v6142_v41 = vpop.f32.mrb[126].mxu1  ;;  %v398_v59 = vld [vmem:[%s6476_s2 + $0x28] sm:$0xff] }
 0x401   :  { %v4574_v47 = vpop.f32.mrb[127].mxu1 }
 0x402   :  { %v397_v47 = vld [vmem:[%s6476_s2 + $0x20] sm:$0xff]  ;;  %s5049_s2 = smov 32  }
 0x406   :  { %3984 = vmatmul.mubr.msk.bf16.gmra.mrb[116].mxu0 %vm501_vm6, %v5290_v61  ;;  %v6146_v14 = vpop.f32.mrb[102].mxu1 }
 0x407   :  { %v6148_v60 = vpop.f32.mrb[103].mxu1  ;;  %2794 = vmatprep.mubr.f32.mxu0 %v6567_v50 }
 0x40a   :  { %v6151_v51 = vpop.f32.mrb[128].mxu1 }
 0x40b   :  { %v6153_v52 = vpop.f32.mrb[129].mxu1 }
 0x40e   :  { %3990 = vmatmul.mubr.msk.f32.vlgmr.msra.gmra.mrb[120].mxu0 %vm709_vm8, %v5998_v0  ;;  %v6157_v10 = vpop.f32.mrb[130].mxu1 }
 0x40f   :  { %4807 = vmatpush3.bf16.msk.msra.mxu0 %vm5232_vm5, %v5262_v49  ;;  %v6162_v61 = vpop.f32.mrb[131].mxu1  ;;  %2800 = vmatprep.mubr.f32.mxu0 %v6567_v50 }
 0x410   :  { %4841 = vmatprep.subr.bf16.mxu0 %v6592_v40 }
 0x412   :  { %3991 = vmatmul.mubr.msk.f32.gmra.mrb[122].mxu0 %vm709_vm8, %v6005_v18  ;;  %v6168_v44 = vpop.f32.mrb[132].mxu1 }
 0x413   :  { %v6170_v31 = vpop.f32.mrb[133].mxu1  ;;  %2806 = vmatprep.mubr.f32.mxu0 %v6567_v50 }
 0x416   :  { %3992 = vmatmul.mubr.msk.f32.gmra.mrb[124].mxu0 %vm709_vm8, %v6012_v21  ;;  %v6175_v38 = vpop.f32.mrb[134].mxu1 }
 0x417   :  { %v6177_v49 = vpop.f32.mrb[135].mxu1  ;;  %2812 = vmatprep.mubr.f32.mxu0 %v6567_v50 }
 0x41a   :  { %3993 = vmatmul.mubr.msk.f32.gmra.mrb[126].mxu0 %vm709_vm8, %v6019_v24  ;;  %v6182_v56 = vpop.f32.mrb[136].mxu1 }
 0x41b   :  { %v6184_v6 = vpop.f32.mrb[137].mxu1  ;;  %2818 = vmatprep.mubr.f32.mxu0 %v6567_v50 }
 0x41e   :  { %3994 = vmatmul.mubr.msk.f32.gmra.mrb[128].mxu0 %vm709_vm8, %v6026_v27 }
 0x41f   :  { %2824 = vmatprep.mubr.f32.mxu0 %v6567_v50 }
 0x422   :  { %3995 = vmatmul.mubr.msk.f32.gmra.mrb[130].mxu0 %vm709_vm8, %v6033_v30 }
 0x423   :  { %4579 = vmatprep.mubr.msk.f32.mxu0 %vm709_vm8, %v5998_v0  ;;  %v6597_v0 = vld [vmem:[#allocation21_spill] sm:$0xff] }
 0x426   :  { %4580 = vmatmul.mubr.msk.f32.vlgmr.msra.gmra.mrb[132].mxu0 %vm709_vm8, %v6005_v18  ;;  %v6598_v18 = vld [vmem:[#allocation22_spill] sm:$0xff] }
 0x427   :  { %4582 = vmatprep.mubr.msk.f32.mxu0 %vm709_vm8, %v6012_v21  ;;  %4843 = vmatpush3.bf16.msra.mxu0 %v6593_v8  ;;  %v6599_v21 = vld [vmem:[#allocation23_spill] sm:$0xff] }
 0x428   :  { %4845 = vmatprep.subr.bf16.mxu0 %v6594_v11 }
 0x42a   :  { %4583 = vmatmul.mubr.msk.f32.gmra.mrb[134].mxu0 %vm709_vm8, %v6019_v24  ;;  %v6602_v24 = vld [vmem:[#allocation26_spill] sm:$0xff] }
 0x42b   :  { %4585 = vmatprep.mubr.msk.f32.mxu0 %vm709_vm8, %v6026_v27  ;;  %4847 = vmatpush3.bf16.msra.mxu0 %v6595_v26  ;;  %v6603_v27 = vld [vmem:[#allocation27_spill] sm:$0xff] }
 0x42c   :  { %4849 = vmatprep.subr.bf16.mxu0 %v6596_v29 }
 0x42e   :  { %4586 = vmatmul.mubr.msk.f32.gmra.mrb[136].mxu0 %vm709_vm8, %v6033_v30  ;;  %v6607_v30 = vld [vmem:[#allocation31_spill] sm:$0xff] }
 0x42f   :  { %4851 = vmatpush3.bf16.msra.mxu0 %v6597_v0 }
 0x430   :  { %4853 = vmatprep.subr.bf16.mxu0 %v6598_v18 }
 0x433   :  { %4855 = vmatpush3.bf16.msra.mxu0 %v6599_v21 }
 0x434   :  { %4857 = vmatprep.subr.bf16.mxu0 %v6600_v55 }
 0x437   :  { %4859 = vmatpush3.bf16.msra.mxu0 %v6601_v5 }
 0x438   :  { %4861 = vmatprep.subr.bf16.mxu0 %v6602_v24 }
 0x43b   :  { %4863 = vmatpush3.bf16.msra.mxu0 %v6603_v27 }
 0x43c   :  { %4865 = vmatprep.subr.bf16.mxu0 %v6604_v36 }
 0x43f   :  { %4867 = vmatpush3.bf16.msra.mxu0 %v6605_v9 }
 0x440   :  { %4869 = vmatprep.subr.bf16.mxu0 %v6606_v12 }
 0x443   :  { %4871 = vmatpush3.bf16.msra.mxu0 %v6607_v30 }
 0x4b5   :  { %v4550_v32 = vpop.f32.mrb[102].mxu0 }
 0x4b6   :  { %v2422_v63 = vmul.f32 %v4550_v32, %v394_v1  ;;  %v2392_v33 = vpop.f32.mrb[103].mxu0 }
 0x4b7   :  { %v2421_v2 = vmul.f32 %v2392_v33, %v393_v15 }
 0x4b9   :  { %v4915_v43 = vpack.i.bf16 %v2422_v63, %v2421_v2 }
 0x4bb   :  { %4916 = vrot.lane.b32.xlu0 %v4915_v43, %s5048_s17 }
 0x4bd   :  { %v4553_v57 = vpop.f32.mrb[104].mxu0 }
 0x4be   :  { %v2424_v3 = vmul.f32 %v4553_v57, %v396_v42  ;;  %v2402_v62 = vpop.f32.mrb[105].mxu0 }
 0x4bf   :  { %v2423_v20 = vmul.f32 %v2402_v62, %v395_v58 }
 0x4c1   :  { %v4920_v54 = vpack.i.bf16 %v2424_v3, %v2423_v20 }
 0x4c3   :  { %4921 = vrot.lane.b32.xlu0 %v4920_v54, %s5048_s17 }
 0x4c5   :  { %v4556_v40 = vpop.f32.mrb[106].mxu0 }
 0x4c6   :  { %v2426_v8 = vmul.f32 %v4556_v40, %v398_v59  ;;  %v2412_v11 = vpop.f32.mrb[107].mxu0 }
 0x4c7   :  { %v2425_v26 = vmul.f32 %v2412_v11, %v397_v47 }
 0x4c9   :  { %v4925_v29 = vpack.i.bf16 %v2426_v8, %v2425_v26  ;;  %v2620_v0 = vpop.f32.mrb[108].mxu0 }
 0x4ca   :  { %v3029_v18 = vmul.f32 %v6146_v14, %v2620_v0  ;;  %v2622_v21 = vpop.f32.mrb[109].mxu0 }
 0x4cb   :  { %v3030_v55 = vmul.f32 %v6148_v60, %v2622_v21  ;;  %v2624_v5 = vpop.f32.mrb[110].mxu0  ;;  %4926 = vrot.lane.b32.xlu0 %v4925_v29, %s5048_s17 }
 0x4cc   :  { %v3034_v24 = vmul.f32 %v6151_v51, %v2624_v5  ;;  %v2626_v27 = vpop.f32.mrb[111].mxu0 }
 0x4cd   :  { %v3035_v36 = vmul.f32 %v6153_v52, %v2626_v27  ;;  %3234 = vmatprep.mubr.f32.mxu0 %v3030_v55 }
 0x4ce   :  { %3235 = vmatmul.mubr.f32.vlgmr.msra.gmra.mrb[138].mxu0 %v3029_v18 }
 0x4cf   :  { %3239 = vmatprep.mubr.f32.mxu0 %v3035_v36 }
 0x4d1   :  { %v2630_v9 = vpop.f32.mrb[112].mxu0 }
 0x4d2   :  { %v3039_v12 = vmul.f32 %v6157_v10, %v2630_v9  ;;  %v2632_v30 = vpop.f32.mrb[113].mxu0  ;;  %3240 = vmatmul.mubr.f32.gmra.mrb[140].mxu0 %v3034_v24  ;;  %v6610_v9 = vld [vmem:[#allocation8_spill] sm:$0xff] }
 0x4d3   :  { %v3040_v14 = vmul.f32 %v6162_v61, %v2632_v30  ;;  %v2634_v1 = vpop.f32.mrb[114].mxu0  ;;  %v6611_v30 = vld [vmem:[#allocation7_spill] sm:$0xff] }
 0x4d4   :  { %v3044_v60 = vmul.f32 %v6168_v44, %v2634_v1  ;;  %v2636_v15 = vpop.f32.mrb[115].mxu0 }
 0x4d5   :  { %v3045_v32 = vmul.f32 %v6170_v31, %v2636_v15  ;;  %3244 = vmatprep.mubr.f32.mxu0 %v3040_v14  ;;  %v402_v15 = vld [vmem:[%s6486_s12 + $0x18] sm:$0xff] }
 0x4d6   :  { %3245 = vmatmul.mubr.f32.gmra.mrb[142].mxu0 %v3039_v12 }
 0x4d7   :  { %3249 = vmatprep.mubr.f32.mxu0 %v3045_v32 }
 0x4d9   :  { %v2640_v51 = vpop.f32.mrb[116].mxu0 }
 0x4da   :  { %v3049_v52 = vmul.f32 %v6175_v38, %v2640_v51  ;;  %v2642_v63 = vpop.f32.mrb[117].mxu0  ;;  %3250 = vmatmul.mubr.f32.gmra.mrb[144].mxu0 %v3044_v60  ;;  %v400_v60 = vld [vmem:[%s6486_s12 + $0x8] sm:$0xff] }
 0x4db   :  { %v3050_v10 = vmul.f32 %v6177_v49, %v2642_v63  ;;  %v2644_v33 = vpop.f32.mrb[118].mxu0  ;;  %v4872_v32 = vpack.c.bf16 %v402_v15, %v400_v60  ;;  %v401_v63 = vld [vmem:[%s6486_s12 + $0x10] sm:$0xff] }
 0x4dc   :  { %v3054_v2 = vmul.f32 %v6182_v56, %v2644_v33  ;;  %v2646_v61 = vpop.f32.mrb[119].mxu0 }
 0x4dd   :  { %v3055_v43 = vmul.f32 %v6184_v6, %v2646_v61  ;;  %3254 = vmatprep.mubr.f32.mxu0 %v3050_v10  ;;  %4873 = vmatprep.subr.bf16.mxu0 %v4872_v32  ;;  %v6612_v61 = vld [vmem:[#allocation9_spill] sm:$0xff] }
 0x4de   :  { %3255 = vmatmul.mubr.f32.gmra.mrb[146].mxu0 %v3049_v52  ;;  %v399_v52 = vld [vmem:[%s6486_s12] sm:$0xff] }
 0x4df   :  { %3259 = vmatprep.mubr.f32.mxu0 %v3055_v43 }
 0x4e1   :  { %v2796_v44 = vpop.f32.mrb[120].mxu0 }
 0x4e2   :  { %v3027_v31 = vmul.f32 %v2796_v44, %v6070_v23  ;;  %v2798_v42 = vpop.f32.mrb[121].mxu0  ;;  %3260 = vmatmul.mubr.f32.gmra.mrb[148].mxu0 %v3054_v2  ;;  %v4874_v2 = vpack.c.bf16 %v401_v63, %v399_v52  ;;  %v6613_v44 = vld [vmem:[#allocation10_spill] sm:$0xff] }
 0x4e3   :  { %v3028_v38 = vmul.f32 %v2798_v42, %v6072_v48  ;;  %3442 = vmatprep.mubr.f32.mxu0 %v6567_v50 }
 0x4e4   :  { %4875 = vmatpush1.bf16.msra.mxu0 %v4874_v2 }
 0x4e5   :  { %v2802_v58 = vpop.f32.mrb[122].mxu0  ;;  %3139 = vmatprep.mubr.f32.mxu1 %v3028_v38  ;;  %v404_v38 = vld [vmem:[%s6486_s12 + $0x28] sm:$0xff] }
 0x4e6   :  { %v3032_v49 = vmul.f32 %v2802_v58, %v6074_v45  ;;  %v2804_v56 = vpop.f32.mrb[123].mxu0  ;;  %3140 = vmatmul.mubr.f32.vlgmr.msra.gmra.mrb[138].mxu1 %v3027_v31  ;;  %v406_v58 = vld [vmem:[%s6486_s12 + $0x38] sm:$0xff] }
 0x4e7   :  { %v3033_v6 = vmul.f32 %v2804_v56, %v6076_v16  ;;  %4589 = vmatpush3.msra.mxu1 %v6051_v13  ;;  %v403_v56 = vld [vmem:[%s6486_s12 + $0x20] sm:$0xff] }
 0x4e9   :  { %v2808_v57 = vpop.f32.mrb[124].mxu0  ;;  %3144 = vmatprep.mubr.f32.mxu1 %v3033_v6  ;;  %v405_v6 = vld [vmem:[%s6486_s12 + $0x30] sm:$0xff] }
 0x4ea   :  { %v3037_v23 = vmul.f32 %v2808_v57, %v6079_v19  ;;  %v2810_v3 = vpop.f32.mrb[125].mxu0  ;;  %3145 = vmatmul.mubr.f32.gmra.mrb[140].mxu1 %v3032_v49  ;;  %v4876_v49 = vpack.c.bf16 %v406_v58, %v404_v38  ;;  %v4878_v57 = vpack.c.bf16 %v405_v6, %v403_v56 }
 0x4eb   :  { %v3038_v48 = vmul.f32 %v2810_v3, %v6081_v35  ;;  %v407_v3 = vld [vmem:[%s6486_s12 + $0x40] sm:$0xff] }
 0x4ec   :  { %4877 = vmatprep.subr.bf16.mxu0 %v4876_v49 }
 0x4ed   :  { %v2814_v62 = vpop.f32.mrb[126].mxu0  ;;  %3149 = vmatprep.mubr.f32.mxu1 %v3038_v48  ;;  %4879 = vmatpush1.bf16.msra.mxu0 %v4878_v57 }
 0x4ee   :  { %v3042_v20 = vmul.f32 %v2814_v62, %v6086_v17  ;;  %v2816_v54 = vpop.f32.mrb[127].mxu0  ;;  %3150 = vmatmul.mubr.f32.gmra.mrb[142].mxu1 %v3037_v23  ;;  %v408_v23 = vld [vmem:[%s6486_s12 + $0x48] sm:$0xff] }
 0x4ef   :  { %v3043_v45 = vmul.f32 %v2816_v54, %v6091_v25  ;;  %3386 = vmatprep.subr.mxu0 %v408_v23 }
 0x4f1   :  { %v2820_v59 = vpop.f32.mrb[128].mxu0  ;;  %3154 = vmatprep.mubr.f32.mxu1 %v3043_v45  ;;  %3387 = vmatpush1.msra.mxu0 %v407_v3 }
 0x4f2   :  { %v3047_v13 = vmul.f32 %v2820_v59, %v6101_v22  ;;  %v2822_v16 = vpop.f32.mrb[129].mxu0  ;;  %3155 = vmatmul.mubr.f32.gmra.mrb[144].mxu1 %v3042_v20 }
 0x4f3   :  { %v3048_v19 = vmul.f32 %v2822_v16, %v6103_v7 }
 0x4f5   :  { %v2826_v47 = vpop.f32.mrb[130].mxu0  ;;  %3159 = vmatprep.mubr.f32.mxu1 %v3048_v19 }
 0x4f6   :  { %v3052_v35 = vmul.f32 %v2826_v47, %v6105_v4  ;;  %v2828_v40 = vpop.f32.mrb[131].mxu0  ;;  %3160 = vmatmul.mubr.f32.gmra.mrb[146].mxu1 %v3047_v13 }
 0x4f7   :  { %v3053_v17 = vmul.f32 %v2828_v40, %v6109_v28 }
 0x4f9   :  { %v4581_v8 = vpop.f32.mrb[132].mxu0  ;;  %3164 = vmatprep.mubr.f32.mxu1 %v3053_v17 }
 0x4fa   :  { %v3036_v25 = vmul.f32 %v4581_v8, %v6120_v39  ;;  %v2998_v11 = vpop.f32.mrb[133].mxu0  ;;  %3165 = vmatmul.mubr.f32.gmra.mrb[148].mxu1 %v3052_v35 }
 0x4fb   :  { %v3031_v22 = vmul.f32 %v2998_v11, %v6117_v53 }
 0x4fd   :  { %v4584_v26 = vpop.f32.mrb[134].mxu0  ;;  %4590 = vmatprep.mubr.msk.f32.mxu1 %vm1071_vm9, %v3031_v22 }
 0x4fe   :  { %v3046_v7 = vmul.f32 %v4584_v26, %v6132_v34  ;;  %v3008_v29 = vpop.f32.mrb[135].mxu0  ;;  %4591 = vmatmul.mubr.msk.f32.vlgmr.msra.gmra.mrb[150].mxu1 %vm1071_vm9, %v3036_v25 }
 0x4ff   :  { %v3041_v4 = vmul.f32 %v3008_v29, %v6126_v37 }
 0x501   :  { %v4587_v0 = vpop.f32.mrb[136].mxu0  ;;  %4593 = vmatprep.mubr.msk.f32.mxu1 %vm1071_vm9, %v3041_v4 }
 0x502   :  { %v3056_v28 = vmul.f32 %v4587_v0, %v6142_v41  ;;  %v3018_v39 = vpop.f32.mrb[137].mxu0  ;;  %4594 = vmatmul.mubr.msk.f32.gmra.mrb[152].mxu1 %vm1071_vm9, %v3046_v7  ;;  %v6608_v41 = vld [vmem:[#allocation6_spill] sm:$0xff] }
 0x503   :  { %v3051_v53 = vmul.f32 %v3018_v39, %v6139_v46  ;;  %v6609_v46 = vld [vmem:[#allocation5_spill] sm:$0xff] }
 0x505   :  { %4596 = vmatprep.mubr.msk.f32.mxu1 %vm1071_vm9, %v3051_v53 }
 0x506   :  { %4597 = vmatmul.mubr.msk.f32.gmra.mrb[154].mxu1 %vm1071_vm9, %v3056_v28 }
 0x507   :  { %3667 = vmatprep.mubr.f32.mxu1 %v6567_v50 }
 0x52d   :  { %v6276_v34 = vpop.permute.xlu0 %4916 }
 0x52e   :  { %v4919_v37 = vunpack.i.h.bf16 %v6276_v34  ;;  %v4918_v18 = vunpack.i.l.bf16 %v6276_v34 }
 0x530   :  { %v6284_v21 = vsel %vm501_vm6, %v6608_v41, %v4919_v37  ;;  %v6290_v55 = vsel %vm501_vm6, %v6609_v46, %v4918_v18 }
 0x531   :  { %v4882_v5 = vpack.c.bf16 %v6284_v21, %v6290_v55  ;;  %v4023_v21 = vld [vmem:[%s6478_s4] ss:$0 sm:$0xff]  ;;  %s5050_s4 = smov [#allocation2]  }
 0x532   :  { %s3790_s17 = sshll.u32 %s5050_s4, 4  ;;  %s3791_s17 = int_to_ptr.vmem [resolvable:$true] %s3790_s17 }
 0x533   :  { %s5018_s0 = scalar_lea.vmem %s3791_s17, 768  ;;  %p5023_p1 = scmp.lt.s32.totalorder %s3791_s17, %s3791_s17 }
 0x534   :  { %p5019_p0 = scmp.ne.s32.totalorder %s3791_s17, %s5018_s0  ;;  %p5024_p2 = scmp.lt.s32.totalorder %s5018_s0, %s5018_s0 }
 0x535   :  { %v6294_v24 = vpop.permute.xlu0 %4921 }
 0x536   :  { %v4924_v27 = vunpack.i.h.bf16 %v6294_v24  ;;  %v4923_v36 = vunpack.i.l.bf16 %v6294_v24  ;;  %p5025_p3 = por %p5024_p2, %p5023_p1 }
 0x538   :  { %v6302_v12 = vsel %vm501_vm6, %v6610_v9, %v4924_v27  ;;  %v6308_v14 = vsel %vm501_vm6, %v6611_v30, %v4923_v36  ;;  %p5026_p4 = pnand %p5025_p3, %p5019_p0 }
 0x539   :  { %v4886_v1 = vpack.c.bf16 %v6302_v12, %v6308_v14 }
 0x53d   :  { %v6318_v51 = vpop.permute.xlu0 %4926 }
 0x53e   :  { %v4929_v10 = vunpack.i.h.bf16 %v6318_v51  ;;  %v4928_v33 = vunpack.i.l.bf16 %v6318_v51 }
 0x540   :  { %v6332_v43 = vsel %vm501_vm6, %v6612_v61, %v4928_v33  ;;  %v6338_v31 = vsel %vm501_vm6, %v6613_v44, %v4929_v10 }
 0x541   :  { %v4890_v42 = vpack.c.bf16 %v6338_v31, %v6332_v43 }
 0x5a1   :  { %v4395_v48 = vpop.f32.mrb[138].mxu0 }
 0x5a2   :  { %v4396_v62 = vpop.f32.mrb[139].mxu0 }
 0x5a3   :  { %v4397_v20 = vadd.f32 %v4396_v62, %v4395_v48 }
 0x5a5   :  { %v4398_v54 = vpop.f32.mrb[140].mxu0 }
 0x5a6   :  { %v4399_v45 = vpop.f32.mrb[141].mxu0 }
 0x5a7   :  { %v4400_v59 = vadd.f32 %v4399_v45, %v4398_v54 }
 0x5a9   :  { %v4401_v13 = vpop.f32.mrb[142].mxu0 }
 0x5aa   :  { %v4402_v16 = vpop.f32.mrb[143].mxu0 }
 0x5ab   :  { %v4403_v19 = vadd.f32 %v4402_v16, %v4401_v13 }
 0x5ad   :  { %v4404_v47 = vpop.f32.mrb[144].mxu0 }
 0x5ae   :  { %v4405_v35 = vpop.f32.mrb[145].mxu0 }
 0x5af   :  { %v4406_v40 = vadd.f32 %v4405_v35, %v4404_v47 }
 0x5b1   :  { %v4407_v17 = vpop.f32.mrb[146].mxu0 }
 0x5b2   :  { %v4408_v8 = vpop.f32.mrb[147].mxu0 }
 0x5b3   :  { %v4409_v25 = vadd.f32 %v4408_v8, %v4407_v17  ;;  %v411_v17 = vld [vmem:[%s6477_s3 + $0x10] sm:$0xff]  ;;  %v410_v8 = vld [vmem:[%s6477_s3 + $0x8] sm:$0xff] }
 0x5b5   :  { %v4410_v11 = vpop.f32.mrb[148].mxu0 }
 0x5b6   :  { %v4411_v22 = vpop.f32.mrb[149].mxu0 }
 0x5b7   :  { %v4412_v26 = vadd.f32 %v4411_v22, %v4410_v11 }
 0x5b9   :  { %v4345_v7 = vpop.f32.mrb[138].mxu1 }
 0x5ba   :  { %v4346_v29 = vpop.f32.mrb[139].mxu1 }
 0x5bb   :  { %v4347_v4 = vadd.f32 %v4346_v29, %v4345_v7 }
 0x5bd   :  { %v4348_v0 = vpop.f32.mrb[140].mxu1  ;;  %v3237_v28 = vadd.f32 %v4397_v20, %v4347_v4 }
 0x5be   :  { %v4349_v39 = vpop.f32.mrb[141].mxu1 }
 0x5bf   :  { %v4350_v53 = vadd.f32 %v4349_v39, %v4348_v0 }
 0x5c1   :  { %v4351_v41 = vpop.f32.mrb[142].mxu1  ;;  %v3242_v46 = vadd.f32 %v4400_v59, %v4350_v53 }
 0x5c2   :  { %v4352_v9 = vpop.f32.mrb[143].mxu1 }
 0x5c3   :  { %v4353_v30 = vadd.f32 %v4352_v9, %v4351_v41  ;;  %v413_v41 = vld [vmem:[%s6477_s3 + $0x20] sm:$0xff]  ;;  %v414_v9 = vld [vmem:[%s6477_s3 + $0x28] sm:$0xff] }
 0x5c5   :  { %v4354_v60 = vpop.f32.mrb[144].mxu1  ;;  %v3247_v15 = vadd.f32 %v4403_v19, %v4353_v30  ;;  %v416_v30 = vld [vmem:[%s6477_s3 + $0x38] sm:$0xff] }
 0x5c6   :  { %v4355_v32 = vpop.f32.mrb[145].mxu1 }
 0x5c7   :  { %v4356_v52 = vadd.f32 %v4355_v32, %v4354_v60 }
 0x5c9   :  { %v4357_v63 = vpop.f32.mrb[146].mxu1  ;;  %v3252_v2 = vadd.f32 %v4406_v40, %v4356_v52  ;;  %v409_v40 = vld [vmem:[%s6477_s3] sm:$0xff] }
 0x5ca   :  { %v4358_v61 = vpop.f32.mrb[147].mxu1 }
 0x5cb   :  { %v4359_v44 = vadd.f32 %v4358_v61, %v4357_v63 }
 0x5cd   :  { %v4360_v38 = vpop.f32.mrb[148].mxu1  ;;  %v3257_v58 = vadd.f32 %v4409_v25, %v4359_v44  ;;  %v412_v25 = vld [vmem:[%s6477_s3 + $0x18] sm:$0xff] }
 0x5ce   :  { %v4361_v49 = vpop.f32.mrb[149].mxu1 }
 0x5cf   :  { %v4362_v56 = vadd.f32 %v4361_v49, %v4360_v38  ;;  %v417_v49 = vld [vmem:[%s6477_s3 + $0x40] sm:$0xff] }
 0x5d1   :  { %v4592_v6 = vpop.f32.mrb[150].mxu1  ;;  %v3262_v57 = vadd.f32 %v4412_v26, %v4362_v56  ;;  %v419_v56 = vld [vmem:[%s6477_s3 + $0x50] sm:$0xff] }
 0x5d2   :  { %v3337_v23 = vadd.f32 %v4592_v6, %v3242_v46  ;;  %v3331_v3 = vpop.f32.mrb[151].mxu1  ;;  %v415_v46 = vld [vmem:[%s6477_s3 + $0x30] sm:$0xff]  ;;  %v418_v6 = vld [vmem:[%s6477_s3 + $0x48] sm:$0xff] }
 0x5d3   :  { %v3332_v48 = vadd.f32 %v3331_v3, %v3237_v28 }
 0x5d5   :  { %v4595_v62 = vpop.f32.mrb[152].mxu1  ;;  %4017 = vmatmul.mubr.msk.f32.vlgmr.msra.gmra.mrb[150].mxu0 %vm501_vm6, %v3332_v48 }
 0x5d6   :  { %v3347_v20 = vadd.f32 %v4595_v62, %v3252_v2  ;;  %v3341_v54 = vpop.f32.mrb[153].mxu1  ;;  %3448 = vmatprep.mubr.f32.mxu0 %v6567_v50 }
 0x5d7   :  { %v3342_v45 = vadd.f32 %v3341_v54, %v3247_v15 }
 0x5d9   :  { %v4598_v59 = vpop.f32.mrb[154].mxu1  ;;  %4018 = vmatmul.mubr.msk.f32.gmra.mrb[152].mxu0 %vm501_vm6, %v3337_v23 }
 0x5da   :  { %v3357_v13 = vadd.f32 %v4598_v59, %v3262_v57  ;;  %v3351_v16 = vpop.f32.mrb[155].mxu1  ;;  %3454 = vmatprep.mubr.f32.mxu0 %v6567_v50  ;;  %v420_v57 = vld [vmem:[%s6477_s3 + $0x58] sm:$0xff] }
 0x5db   :  { %v3352_v19 = vadd.f32 %v3351_v16, %v3257_v58 }
 0x5dd   :  { %4019 = vmatmul.mubr.msk.f32.gmra.mrb[154].mxu0 %vm501_vm6, %v3342_v45 }
 0x5de   :  { %3460 = vmatprep.mubr.f32.mxu0 %v6567_v50 }
 0x5e1   :  { %4020 = vmatmul.mubr.msk.f32.gmra.mrb[156].mxu0 %vm501_vm6, %v3347_v20 }
 0x5e2   :  { %3466 = vmatprep.mubr.f32.mxu0 %v6567_v50 }
 0x5e5   :  { %4021 = vmatmul.mubr.msk.f32.gmra.mrb[158].mxu0 %vm501_vm6, %v3352_v19 }
 0x5e6   :  { %3472 = vmatprep.mubr.f32.mxu0 %v6567_v50 }
 0x5e9   :  { %4022 = vmatmul.mubr.msk.f32.gmra.mrb[160].mxu0 %vm501_vm6, %v3357_v13 }
 0x6a8   :  { %v3444_v47 = vpop.f32.mrb[150].mxu0 }
 0x6a9   :  { %v3446_v35 = vpop.f32.mrb[151].mxu0  ;;  %v3479_v22 = vmul.f32 %v3444_v47, %v409_v40 }
 0x6aa   :  { %v3480_v29 = vmul.f32 %v3446_v35, %v410_v8 }
 0x6ac   :  { %v3450_v11 = vpop.f32.mrb[152].mxu0 }
 0x6ad   :  { %v3481_v26 = vmul.f32 %v3450_v11, %v411_v17  ;;  %v3452_v7 = vpop.f32.mrb[153].mxu0  ;;  %v3583_v11 = vlaneseq }
 0x6ae   :  { %v3482_v4 = vmul.f32 %v3452_v7, %v412_v25 }
 0x6af   :  { %v4930_v0 = vpack.i.bf16 %v3481_v26, %v3479_v22  ;;  %v3584_v26 = vshrl.u32 %v3583_v11, 7 }
 0x6b0   :  { %v4945_v28 = vpack.i.bf16 %v3482_v4, %v3480_v29  ;;  %v3456_v39 = vpop.f32.mrb[154].mxu0 }
 0x6b1   :  { %4931 = vrot.lane.b32.xlu1 %v4930_v0, %s5049_s2  ;;  %v3458_v53 = vpop.f32.mrb[155].mxu0  ;;  %v3483_v15 = vmul.f32 %v3456_v39, %v413_v41  ;;  %vm3590_vm11 = vcmp.eq.s32.totalorder %v3584_v26, %v4023_v21 }
 0x6b2   :  { %4946 = vrot.lane.b32.xlu0 %v4945_v28, %s5049_s2  ;;  %v3484_v63 = vmul.f32 %v3458_v53, %v414_v9  ;;  %v3585_v28 = vadd.s32 8, %v3584_v26 }
 0x6b4   :  { %v3462_v60 = vpop.f32.mrb[156].mxu0  ;;  %vm3591_vm13 = vcmp.eq.s32.totalorder %v3585_v28, %v4023_v21 }
 0x6b5   :  { %v3485_v32 = vmul.f32 %v3462_v60, %v415_v46  ;;  %v3464_v52 = vpop.f32.mrb[157].mxu0  ;;  %v4024_v46 = vsel %vm3590_vm11, 1.0, %v6567_v50 }
 0x6b6   :  { %v3486_v2 = vmul.f32 %v3464_v52, %v416_v30 }
 0x6b7   :  { %v4935_v61 = vpack.i.bf16 %v3485_v32, %v3483_v15  ;;  %v4025_v32 = vsel %vm3591_vm13, 1.0, %v6567_v50 }
 0x6b8   :  { %v4950_v44 = vpack.i.bf16 %v3486_v2, %v3484_v63  ;;  %v3468_v38 = vpop.f32.mrb[158].mxu0  ;;  %v3771_v2 = vld [vmem:[#allocation2 + $0x28] sm:$0xff] }
 0x6b9   :  { %4936 = vrot.lane.b32.xlu1 %v4935_v61, %s5049_s2  ;;  %v3470_v58 = vpop.f32.mrb[159].mxu0  ;;  %v3487_v3 = vmul.f32 %v3468_v38, %v417_v49  ;;  %v3768_v61 = vld [vmem:[#allocation2 + $0x10] sm:$0xff] }
 0x6ba   :  { %v3488_v20 = vmul.f32 %v3470_v58, %v418_v6 }
 0x6bc   :  { %v3474_v23 = vpop.f32.mrb[160].mxu0 }
 0x6bd   :  { %v3489_v48 = vmul.f32 %v3474_v23, %v419_v56  ;;  %v3476_v62 = vpop.f32.mrb[161].mxu0 }
 0x6be   :  { %v3490_v54 = vmul.f32 %v3476_v62, %v420_v57 }
 0x6bf   :  { %v4940_v45 = vpack.i.bf16 %v3489_v48, %v3487_v3 }
 0x6c0   :  { %v4955_v59 = vpack.i.bf16 %v3490_v54, %v3488_v20 }
 0x6c1   :  { %4941 = vrot.lane.b32.xlu1 %v4940_v45, %s5049_s2 }
 0x6c2   :  { %4956 = vrot.lane.b32.xlu0 %v4955_v59, %s5049_s2 }
 0x6c5   :  { %4951 = vrot.lane.b32.xlu1 %v4950_v44, %s5049_s2 }
 0x723   :  { %v4932_v13 = vpop.permute.xlu1 %4931 }
 0x724   :  { %v4934_v16 = vunpack.i.h.bf16 %v4932_v13  ;;  %v4933_v19 = vunpack.i.l.bf16 %v4932_v13 }
 0x726   :  { %v3576_v47 = vsel %vm3551_vm10, %v4918_v18, %v4933_v19  ;;  %v3577_v35 = vsel %vm3551_vm10, %v4919_v37, %v4934_v16  ;;  %v4947_v18 = vpop.permute.xlu0 %4946 }
 0x727   :  { %v4880_v40 = vpack.c.bf16 %v3577_v35, %v3576_v47  ;;  %v4949_v7 = vunpack.i.h.bf16 %v4947_v18  ;;  %v4948_v29 = vunpack.i.l.bf16 %v4947_v18 }
 0x729   :  { %4881 = vmatprep.subr.bf16.mxu1 %v4880_v40  ;;  %v3552_v4 = vsel %vm3551_vm10, %v4933_v19, %v4948_v29  ;;  %v3553_v12 = vsel %vm3551_vm10, %v4934_v16, %v4949_v7 }
 0x72a   :  { %4883 = vmatpush1.bf16.msra.mxu1 %v4882_v5  ;;  %v4892_v41 = vpack.c.bf16 %v3553_v12, %v3552_v4 }
 0x72b   :  { %v4937_v17 = vpop.permute.xlu1 %4936 }
 0x72c   :  { %v4939_v8 = vunpack.i.h.bf16 %v4937_v17  ;;  %v4938_v25 = vunpack.i.l.bf16 %v4937_v17 }
 0x72e   :  { %v3578_v22 = vsel %vm3551_vm10, %v4923_v36, %v4938_v25  ;;  %v3579_v34 = vsel %vm3551_vm10, %v4924_v27, %v4939_v8 }
 0x72f   :  { %v4884_v37 = vpack.c.bf16 %v3579_v34, %v3578_v22 }
 0x731   :  { %4885 = vmatprep.subr.bf16.mxu1 %v4884_v37 }
 0x732   :  { %4887 = vmatpush1.bf16.msra.mxu1 %v4886_v1 }
 0x733   :  { %v4942_v55 = vpop.permute.xlu1 %4941 }
 0x734   :  { %v4944_v5 = vunpack.i.h.bf16 %v4942_v55  ;;  %v4943_v36 = vunpack.i.l.bf16 %v4942_v55  ;;  %v4957_v14 = vpop.permute.xlu0 %4956 }
 0x735   :  { %v4958_v9 = vunpack.i.l.bf16 %v4957_v14 }
 0x736   :  { %v3580_v24 = vsel %vm3551_vm10, %v4928_v33, %v4943_v36  ;;  %v3581_v27 = vsel %vm3551_vm10, %v4929_v10, %v4944_v5  ;;  %v4959_v33 = vunpack.i.h.bf16 %v4957_v14 }
 0x737   :  { %v4952_v1 = vpop.permute.xlu1 %4951  ;;  %v4888_v0 = vpack.c.bf16 %v3581_v27, %v3580_v24  ;;  %v3556_v60 = vsel %vm3551_vm10, %v4943_v36, %v4958_v9 }
 0x738   :  { %v4954_v39 = vunpack.i.h.bf16 %v4952_v1  ;;  %v4953_v53 = vunpack.i.l.bf16 %v4952_v1  ;;  %v3557_v15 = vsel %vm3551_vm10, %v4944_v5, %v4959_v33 }
 0x739   :  { %4889 = vmatprep.subr.bf16.mxu1 %v4888_v0  ;;  %v4900_v43 = vpack.c.bf16 %v3557_v15, %v3556_v60 }
 0x73a   :  { %4891 = vmatpush1.bf16.msra.mxu1 %v4890_v42  ;;  %v3554_v51 = vsel %vm3551_vm10, %v4938_v25, %v4953_v53  ;;  %v3555_v10 = vsel %vm3551_vm10, %v4939_v8, %v4954_v39 }
 0x73b   :  { %4893 = vmatprep.subr.bf16.mxu1 %v4892_v41  ;;  %v4896_v30 = vpack.c.bf16 %v3555_v10, %v3554_v51 }
 0x73d   :  { %4026 = vmatmul.mubr.msk.f32.vlgmr.msra.gmra.mrb[156].mxu1 %vm3596_vm12, %v4024_v46 }
 0x73e   :  { %4895 = vmatpush3.bf16.msra.mxu1 %v4892_v41  ;;  %3673 = vmatprep.mubr.f32.mxu1 %v6567_v50 }
 0x73f   :  { %4897 = vmatprep.subr.bf16.mxu1 %v4896_v30 }
 0x741   :  { %4027 = vmatmul.mubr.msk.f32.gmra.mrb[158].mxu1 %vm3596_vm12, %v4025_v32 }
 0x742   :  { %4899 = vmatpush3.bf16.msra.mxu1 %v4896_v30  ;;  %4611 = vmatprep.mubr.msk.f32.mxu1 %vm3596_vm12, %v4024_v46 }
 0x743   :  { %4901 = vmatprep.subr.bf16.mxu1 %v4900_v43 }
 0x746   :  { %4903 = vmatpush3.bf16.msra.mxu1 %v4900_v43 }
 0x749   :  { %4612 = vmatmul.mubr.msk.f32.vlgmr.msra.gmra.mrb[160].mxu1 %vm3596_vm12, %v4025_v32 }
 0x810   :  { %v3669_v31 = vpop.f32.mrb[156].mxu1 }
 0x811   :  { %v3671_v42 = vpop.f32.mrb[157].mxu1  ;;  %3778 = vst [vmem:[#allocation2] sm:$0xff] %v3669_v31 }
 0x812   :  { %3779 = vst [vmem:[#allocation2 + $0x8] sm:$0xff] %v3671_v42 }
 0x814   :  { %v3675_v52 = vpop.f32.mrb[158].mxu1 }
 0x815   :  { %v3677_v63 = vpop.f32.mrb[159].mxu1  ;;  %3782 = vst [vmem:[#allocation2 + $0x18] sm:$0xff] %v3675_v52 }
 0x816   :  { %3783 = vst [vmem:[#allocation2 + $0x20] sm:$0xff] %v3677_v63 }
 0x81c   :  { %v4613_v44 = vpop.f32.mrb[160].mxu1 }
 0x81d   :  { %v3777_v38 = vadd.f32 %v4613_v44, %v3771_v2  ;;  %v3746_v58 = vpop.f32.mrb[161].mxu1 }
 0x81e   :  { %v3774_v49 = vadd.f32 %v3768_v61, %v3746_v58 }
 0x81f   :  { %3784 = vst.msk [vmem:[#allocation2 + $0x28] sm:$0xff] %vm3761_vm14, %v3777_v38 }
 0x820   :  { %3781 = vst.msk [vmem:[#allocation2 + $0x10] sm:$0xff] %vm3761_vm14, %v3774_v49 }
 0x821   :  { %5029 = shalt.err (!%p5026_p4)
}
 0x822   :  { %s5030_s1 = scalar_lea.hbm %s6487_s13, 768 }
 0x823   :  { %p5031_p5 = scmp.ne.s32.totalorder %s6487_s13, %s5030_s1  ;;  %p5034_p6 = scmp.lt.u32.totalorder %s5030_s1, %s6487_s13 }
 0x825   :  { %p5036_p7 = pnand %p5034_p6, %p5031_p5 }
 0x827   :  { %5039 = shalt.err (!%p5036_p7)
}
 0x828   :  { %s5051_s22 = smov 384   ;;  %s5052_s2 = smov 24  }
 0x829   :  { %3796 = dma.vmem_to_hbm [thread:$0]  %s3791_s17, 768, %s6487_s13, [#allocation3], %s5051_s22, %s5051_s22, %s5052_s2  }
 0x82a   :  { %5040 = dma.done.wait [#allocation3], 768  }
 0x82b   :  { %5041 = vsyncadd [#allocation3], 4294966528 }
 0x82c   :  { %3800 = vsyncpa [#allocation3], 1 }

</bundles_post_ra>
